<compile_context>
chip_gen: v5e
topology: v5e:2x2
jax: 0.10.0
libtpu: 0.0.40
codegen_flags: <defaults>
</compile_context>

<pallas_src>
import functools

import jax
import jax.numpy as jnp
from jax import lax
from jax.experimental import pallas as pl
from jax.experimental.pallas import tpu as pltpu

_PENALTY = 1e30   # cross-segment distance penalty (folded into the matmul)
_SRC_PAD = 1e30   # distance marker for padded source rows
_BIG = 3e30       # "infinite" distance for pool init / exclusion
_POOL = 128       # lane-padded width of the running top-k scratch


def _round_up(x, mult):
    return ((x + mult - 1) // mult) * mult


def _default_vmem_limit_bytes():
    """~70% of physical VMEM, capped at 96 MiB: ~90 MiB on v5e/v6e (128 MiB parts),
    ~45 MiB on v7x (64 MiB parts). Falls back to the v7x-safe value."""
    try:
        cap = int(pltpu.get_tpu_info().vmem_capacity_bytes)
    except Exception:
        cap = 64 * 1024 * 1024
    return max(32 * 1024 * 1024, min(96 * 1024 * 1024, int(cap * 0.7)))


def _fp_kernel(qaug_ref, saugt_ref, feat_ref, out_ref, pool_ref, norm_ref, *, k):
    # Grid: (query tiles [parallel], phase in {0,1} [arbitrary], M blocks [arbitrary]).
    # qaug_ref  : (TN, KA)    augmented query coords (segment one-hots folded in)
    # saugt_ref : (KA, MB)    augmented source coords for this block (pre-transposed)
    # feat_ref  : (MB, CP)    source features (matmul dtype, typically bf16)
    # out_ref   : (TN, CP)    f32 output block == resident feature accumulator
    # pool_ref  : (TN, 128)   running k smallest d2 (ascending in cols 0..k-1)
    # norm_ref  : (TN, 128)   running weight sum (normalisation), lane-broadcast
    phase = pl.program_id(1)
    j = pl.program_id(2)
    nm = pl.num_programs(2)

    # Pairwise squared distances for this (query tile, source block) via one thin-K
    # f32 MXU matmul.  Same-segment pairs: exact |q-s|^2.  Cross-segment pairs: +1e30.
    d2 = jnp.dot(qaug_ref[...], saugt_ref[...], preferred_element_type=jnp.float32)

    @pl.when(phase == 0)
    def _select():
        @pl.when(j == 0)
        def _():
            pool_ref[...] = jnp.full_like(pool_ref, _BIG)

        kth = pool_ref[:, k - 1:k]                      # current k-th smallest, (TN,1)

        # Early-skip: if no candidate in this block beats any row's running k-th
        # smallest, the pool is already correct.  (Scalar f32 min-reduce + compare.)
        @pl.when(jnp.min(d2 - kth) < 0.0)
        def _():
            tn = d2.shape[0]
            lane = lax.broadcasted_iota(jnp.int32, (tn, _POOL), 1)   # hoisted once
            work = d2                     # this block's candidates
            pool = pool_ref[...]          # carry-in: k smallest seen so far
            new_pool = jnp.full((tn, _POOL), _BIG, jnp.float32)
            for t in range(k):            # k is small & static -> unrolled
                vmin = jnp.minimum(jnp.min(work, axis=-1, keepdims=True),
                                   jnp.min(pool, axis=-1, keepdims=True))
                new_pool = jnp.where(lane == t, vmin, new_pool)
                # Exclude the extracted value (exact ties are excluded together;
                # coincident distinct distances are measure-zero for real clouds).
                work = jnp.where(work == vmin, _BIG, work)
                pool = jnp.where(pool == vmin, _BIG, pool)
            pool_ref[...] = new_pool

    @pl.when(phase == 1)
    def _accumulate():
        @pl.when(j == 0)
        def _():
            out_ref[...] = jnp.zeros_like(out_ref)
            norm_ref[...] = jnp.zeros_like(norm_ref)

        thresh = pool_ref[:, k - 1:k]                   # k-th smallest d2, (TN, 1)

        # Early-skip: blocks with no selected neighbour contribute nothing; skips
        # the rsqrt over (TN, MB) on the single EUP slot and the MXU push.
        @pl.when(jnp.min(d2 - thresh) <= 0.0)
        def _():
            # 1/(sqrt(d2)+1e-8) ~= rsqrt(d2 + 1e-16): one EUP op instead of
            # sqrt + divide (deviation ~1e-8/dist, far below tolerance).
            w = jnp.where(d2 <= thresh,
                          lax.rsqrt(jnp.maximum(d2, 0.0) + 1e-16), 0.0)
            norm_ref[...] += jnp.sum(w, axis=-1, keepdims=True)       # XLU row-reduce
            out_ref[...] += jnp.dot(w.astype(feat_ref.dtype), feat_ref[...],
                                    preferred_element_type=jnp.float32)

        @pl.when(j == nm - 1)
        def _():
            out_ref[...] = out_ref[...] * (1.0 / norm_ref[:, 0:1])


def _offsets_to_batch(offset, n):
    # pointops offsets are cumulative end indices: rows [off[b-1], off[b]) -> batch b
    return jnp.searchsorted(offset, jnp.arange(n), side="right")


def feat_propagation(new_xyz, new_offset, xyz, offset, feat, k, *,
                     tile_n=512, m_block=1024, matmul_dtype=jnp.bfloat16,
                     vmem_limit_bytes=None):
    """Pallas implementation of FeatPropagation.forward (pointops interpolation2).

    tile_n      : query rows per grid step.  Larger tiles directly divide feat
                  HBM re-streaming (total feat traffic ~ (n/tile_n)*m*c_pad bytes).
                  512 fits all generations; on v5e/v6e (128 MiB VMEM) 1024 is fine.
                  Automatically shrunk for small n so the parallel axis has >= 2
                  tiles (keeps both v7x TensorCores busy).
    m_block     : source rows streamed per step (MXU K-dim of the gather matmul);
                  kept a multiple of 128 (prefer 256+); 1024-2048 amortizes the
                  ~0.35us per-step overhead.
    matmul_dtype: operand dtype of the W @ feat gather matmul.  Default bfloat16:
                  every generation's MXU is bf16-native (v7x has no int/f32 path)
                  and feat streaming halves; accuracy ~1e-3 rel.  Use float32 for
                  ~1e-4 parity with the reference (slower, MXU-emulated).
    """
    n = new_xyz.shape[0]
    m, c = feat.shape
    b = offset.shape[0]
    assert 1 <= k <= _POOL

    new_xyz = new_xyz.astype(jnp.float32)
    xyz = xyz.astype(jnp.float32)

    # --- tile sizes ---------------------------------------------------------
    tn = max(8, (min(int(tile_n), _round_up(n, 8)) // 8) * 8)
    # v7x has 2 TensorCores sharing the parallel grid axis: make sure there are
    # at least 2 query tiles whenever n allows it.
    while tn > 8 and _round_up(n, tn) // tn < 2:
        tn = max(8, ((tn // 2) // 8) * 8)
    n_pad = _round_up(n, tn)

    mb = max(128, (min(int(m_block), _round_up(m, 128)) // 128) * 128)
    m_pad = _round_up(m, mb)
    c_pad = _round_up(c, 128)        # lane-dense output width (no +1 norm column)

    # --- augmented coordinates ----------------------------------------------
    # Batch-segment one-hots; the segment mask is folded into the distance matmul:
    #   qaug = [-2x, -2y, -2z, 1, |q|^2, P*onehot(qb)...]
    #   saug = [  x,   y,   z, |s|^2, 1, 1 - onehot(sb)...]
    #   dot  = |q-s|^2 + P*[qb != sb]   (extra products are exactly 0.0 for
    #   same-segment pairs -> no cancellation, full f32 distance precision).
    qb = _offsets_to_batch(new_offset, n)
    sb = _offsets_to_batch(offset, m)
    oq = (qb[:, None] == jnp.arange(b)[None, :]).astype(jnp.float32)   # (n, b)
    osb = (sb[:, None] == jnp.arange(b)[None, :]).astype(jnp.float32)  # (m, b)

    q2 = jnp.sum(new_xyz * new_xyz, axis=-1, keepdims=True)
    s2 = jnp.sum(xyz * xyz, axis=-1, keepdims=True)
    qaug = jnp.concatenate(
        [-2.0 * new_xyz, jnp.ones((n, 1), jnp.float32), q2, _PENALTY * oq], axis=1)
    saug = jnp.concatenate(
        [xyz, s2, jnp.ones((m, 1), jnp.float32), 1.0 - osb], axis=1)
    ka = 5 + b
    ka_pad = _round_up(ka, 8)

    qaug = jnp.pad(qaug, ((0, n_pad - n), (0, ka_pad - ka)))
    saug = jnp.pad(saug, ((0, m_pad - m), (0, ka_pad - ka)))
    if n_pad > n:
        # Padded query rows keep the constant-1 column so they pair with real
        # sources (finite norm, no NaN); their outputs are sliced off anyway.
        qaug = qaug.at[n:, 3].set(1.0)
    if m_pad > m:
        # Padded source rows look infinitely far from every query.
        saug = saug.at[m:, 3].set(_SRC_PAD)
    # Pre-transpose source coords: lane-dense (ka_pad, m_pad) blocks and no
    # implicit RHS transpose inside the kernel.
    saug_t = saug.T

    # --- features -------------------------------------------------------------
    if m == m_pad and c == c_pad and feat.dtype == matmul_dtype:
        feat_pad = feat                      # no extra HBM copy needed
    else:
        feat_pad = jnp.zeros((m_pad, c_pad), matmul_dtype)
        feat_pad = feat_pad.at[:m, :c].set(feat.astype(matmul_dtype))

    if vmem_limit_bytes is None:
        vmem_limit_bytes = _default_vmem_limit_bytes()

    grid = (n_pad // tn, 2, m_pad // mb)
    kernel = functools.partial(_fp_kernel, k=k)

    # VMEM budget (defaults tn=512, mb=1024, c_pad>=128, bf16 feat): double-buffered
    # blocks + the (tn, mb) d2/W temporaries + scratch stay well under ~16 MiB,
    # comfortably inside v7x's 64 MiB as well as v5e/v6e's 128 MiB.
    out = pl.pallas_call(
        kernel,
        out_shape=jax.ShapeDtypeStruct((n_pad, c_pad), jnp.float32),
        grid=grid,
        in_specs=[
            # Query tile: constant across (phase, m-block) -> fetched once per i.
            pl.BlockSpec((tn, ka_pad), lambda i, p, j: (i, 0)),
            # Transposed source coord block: streamed over j in both phases.
            pl.BlockSpec((ka_pad, mb), lambda i, p, j: (0, j)),
            # Feature block: only needed in phase 1; during phase 0 the block
            # index stays pinned at 0 so no extra HBM traffic is issued.
            pl.BlockSpec((mb, c_pad), lambda i, p, j: (j * p, 0)),
        ],
        # Output block index is constant across (phase, m-block): it doubles as the
        # resident f32 accumulator (no separate acc scratch).
        out_specs=pl.BlockSpec((tn, c_pad), lambda i, p, j: (i, 0)),
        scratch_shapes=[
            pltpu.VMEM((tn, _POOL), jnp.float32),   # running k smallest d2
            pltpu.VMEM((tn, 128), jnp.float32),     # running weight sum (norm)
        ],
        compiler_params=pltpu.CompilerParams(
            dimension_semantics=("parallel", "arbitrary", "arbitrary"),
            vmem_limit_bytes=int(vmem_limit_bytes),
        ),
    )(qaug, saug_t, feat_pad)
    return out[:n, :c]


def _reference(new_xyz, new_offset, xyz, offset, feat, k):
    """Pure-JAX reference for interpolation2 semantics."""
    n = new_xyz.shape[0]
    m = xyz.shape[0]
    qb = _offsets_to_batch(new_offset, n)
    sb = _offsets_to_batch(offset, m)
    d2 = jnp.sum((new_xyz[:, None, :] - xyz[None, :, :]) ** 2, axis=-1)
    d2 = jnp.where(qb[:, None] == sb[None, :], d2, jnp.inf)
    neg_top, idx = lax.top_k(-d2, k)                      # k smallest distances
    dist = jnp.sqrt(-neg_top)
    recip = 1.0 / (dist + 1e-8)
    w = recip / jnp.sum(recip, axis=-1, keepdims=True)    # (n, k)
    return jnp.einsum("nk,nkc->nc", w, feat[idx])


if __name__ == "__main__":
    key = jax.random.PRNGKey(0)
    k_group = 4            # FeatPropagation(group_size=4)
    m, n, c = 200, 96, 32  # source points, query (parent) points, feature channels

    k1, k2, k3 = jax.random.split(key, 3)
    xyz = jax.random.uniform(k1, (m, 3), jnp.float32)          # s_pc.coord
    new_xyz = jax.random.uniform(k2, (n, 3), jnp.float32)      # parent_pc.coord
    feat = jax.random.normal(k3, (m, c), jnp.float32)          # s_pc.feat
    offset = jnp.array([100, 200], jnp.int32)                  # s_pc.offset (2 clouds)
    new_offset = jnp.array([48, 96], jnp.int32)                # parent_pc.offset

    ref = _reference(new_xyz, new_offset, xyz, offset, feat, k_group)

    # Small tile overrides exercise every structural path at toy sizes:
    # 2 query tiles (with query padding), 2 streamed M blocks (with source
    # padding), both phases, the pool merge, early-skip guards and finalize.

    # f32 gather-matmul path: ~1e-4 parity with the reference.
    out_f32 = feat_propagation(new_xyz, new_offset, xyz, offset, feat, k_group,
                               tile_n=64, m_block=128, matmul_dtype=jnp.float32)
    out_f32 = jax.block_until_ready(out_f32)
    assert out_f32.shape == (n, c)
    assert jnp.allclose(out_f32, ref, rtol=2e-4, atol=2e-4), (
        float(jnp.max(jnp.abs(out_f32 - ref))))

    # bf16 default (production) path: ~1e-3-level deviation from the reference.
    out_bf16 = feat_propagation(new_xyz, new_offset, xyz, offset, feat, k_group,
                                tile_n=64, m_block=128)
    out_bf16 = jax.block_until_ready(out_bf16)
    assert out_bf16.shape == (n, c)
    assert jnp.allclose(out_bf16, ref, rtol=3e-2, atol=3e-2), (
        float(jnp.max(jnp.abs(out_bf16 - ref))))

    print("KERNEL_OK")
</pallas_src>

<mosaic_0001>
module attributes {stable_mosaic.version = 11 : i64} {
  func.func @_fp_kernel(%arg0: i32, %arg1: i32, %arg2: i32, %arg3: memref<64x8xf32, #tpu.memory_space<vmem>>, %arg4: memref<8x128xf32, #tpu.memory_space<vmem>>, %arg5: memref<128x128xf32, #tpu.memory_space<vmem>>, %arg6: memref<64x128xf32, #tpu.memory_space<vmem>>, %arg7: memref<64x128xf32, #tpu.memory_space<vmem>>, %arg8: memref<64x128xf32, #tpu.memory_space<vmem>>) attributes {dimension_semantics = [#tpu.dimension_semantics<parallel>, #tpu.dimension_semantics<arbitrary>, #tpu.dimension_semantics<arbitrary>], iteration_bounds = array<i64: 2, 2, 2>, scalar_prefetch = 0 : i64, scratch_operands = 2 : i64, tpu.core_type = #tpu.core_type<tc>, window_params = [{transform_indices = @transform_0, window_bounds = array<i64: 64, 8>}, {transform_indices = @transform_1, window_bounds = array<i64: 8, 128>}, {transform_indices = @transform_2, window_bounds = array<i64: 128, 128>}, {transform_indices = @transform_3, window_bounds = array<i64: 64, 128>}]} {
    %c0 = arith.constant 0 : index
    %c0_0 = arith.constant 0 : index
    %0 = vector.load %arg3[%c0, %c0_0] : memref<64x8xf32, #tpu.memory_space<vmem>>, vector<64x8xf32>
    %c0_1 = arith.constant 0 : index
    %c0_2 = arith.constant 0 : index
    %1 = vector.load %arg4[%c0_1, %c0_2] : memref<8x128xf32, #tpu.memory_space<vmem>>, vector<8x128xf32>
    %cst = arith.constant dense<0.000000e+00> : vector<64x128xf32>
    %2 = tpu.matmul %0, %1, %cst {dimension_numbers = #tpu.dot_dimension_numbers<[1], [0], [0], [1], [0, 0, 1, 1], [], []>} : vector<64x8xf32>, vector<8x128xf32>, vector<64x128xf32> -> vector<64x128xf32>
    %c0_i32 = arith.constant 0 : i32
    %3 = arith.cmpi eq, %arg1, %c0_i32 : i32
    %4 = arith.extui %3 : i1 to i32
    %c0_i32_3 = arith.constant 0 : i32
    %5 = arith.cmpi ne, %4, %c0_i32_3 : i32
    scf.if %5 {
      %c0_i32_5 = arith.constant 0 : i32
      %9 = arith.cmpi eq, %arg2, %c0_i32_5 : i32
      %10 = arith.extui %9 : i1 to i32
      %c0_i32_6 = arith.constant 0 : i32
      %11 = arith.cmpi ne, %10, %c0_i32_6 : i32
      scf.if %11 {
        %cst_11 = arith.constant 3.000000e+30 : f32
        %22 = vector.broadcast %cst_11 : f32 to vector<64x128xf32>
        %c0_12 = arith.constant 0 : index
        %c0_13 = arith.constant 0 : index
        %23 = vector.load %arg7[%c0_12, %c0_13] : memref<64x128xf32, #tpu.memory_space<vmem>>, vector<64x128xf32>
        tpu.vector_store %arg7[%c0_12, %c0_13], %22 {strides = array<i32>} : memref<64x128xf32, #tpu.memory_space<vmem>>, vector<64x128xf32>,
      } else {
      }
      %c0_7 = arith.constant 0 : index
      %c3 = arith.constant 3 : index
      %12 = vector.load %arg7[%c0_7, %c3] : memref<64x128xf32, #tpu.memory_space<vmem>>, vector<64x1xf32>
      %13 = vector.broadcast %12 : vector<64x1xf32> to vector<64x128xf32>
      %14 = arith.subf %2, %13 : vector<64x128xf32>
      %15 = vector.shape_cast %14 : vector<64x128xf32> to vector<1x64x128xf32>
      %cst_8 = arith.constant dense<0x7F800000> : vector<1xf32>
      %16 = vector.multi_reduction <minimumf>, %15, %cst_8 [1, 2] : vector<1x64x128xf32> to vector<1xf32>
      %17 = vector.shape_cast %16 : vector<1xf32> to vector<1x1x1xf32>
      %18 = vector.extract %17[0, 0, 0] : f32 from vector<1x1x1xf32>
      %cst_9 = arith.constant 0.000000e+00 : f32
      %19 = arith.cmpf olt, %18, %cst_9 : f32
      %20 = arith.extui %19 : i1 to i32
      %c0_i32_10 = arith.constant 0 : i32
      %21 = arith.cmpi ne, %20, %c0_i32_10 : i32
      scf.if %21 {
        %22 = tpu.iota {dimensions = array<i32: 1>} : vector<64x128xi32>
        %c0_11 = arith.constant 0 : index
        %c0_12 = arith.constant 0 : index
        %23 = vector.load %arg7[%c0_11, %c0_12] : memref<64x128xf32, #tpu.memory_space<vmem>>, vector<64x128xf32>
        %cst_13 = arith.constant 3.000000e+30 : f32
        %24 = vector.broadcast %cst_13 : f32 to vector<64x128xf32>
        %cst_14 = arith.constant dense<0x7F800000> : vector<64xf32>
        %25 = vector.multi_reduction <minimumf>, %2, %cst_14 [1] : vector<64x128xf32> to vector<64xf32>
        %26 = vector.shape_cast %25 : vector<64xf32> to vector<64x1xf32>
        %cst_15 = arith.constant dense<0x7F800000> : vector<64xf32>
        %27 = vector.multi_reduction <minimumf>, %23, %cst_15 [1] : vector<64x128xf32> to vector<64xf32>
        %28 = vector.shape_cast %27 : vector<64xf32> to vector<64x1xf32>
        %29 = arith.minimumf %26, %28 : vector<64x1xf32>
        %c0_i32_16 = arith.constant 0 : i32
        %30 = vector.broadcast %c0_i32_16 : i32 to vector<64x128xi32>
        %31 = arith.cmpi eq, %22, %30 : vector<64x128xi32>
        %32 = vector.shape_cast %29 : vector<64x1xf32> to vector<64x1xf32>
        %33 = vector.broadcast %32 : vector<64x1xf32> to vector<64x128xf32>
        %34 = arith.select %31, %33, %24 : vector<64x128xi1>, vector<64x128xf32>
        %35 = vector.broadcast %29 : vector<64x1xf32> to vector<64x128xf32>
        %36 = arith.cmpf oeq, %2, %35 : vector<64x128xf32>
        %cst_17 = arith.constant 3.000000e+30 : f32
        %37 = vector.broadcast %cst_17 : f32 to vector<64x128xf32>
        %38 = arith.select %36, %37, %2 : vector<64x128xi1>, vector<64x128xf32>
        %39 = vector.broadcast %29 : vector<64x1xf32> to vector<64x128xf32>
        %40 = arith.cmpf oeq, %23, %39 : vector<64x128xf32>
        %cst_18 = arith.constant 3.000000e+30 : f32
        %41 = vector.broadcast %cst_18 : f32 to vector<64x128xf32>
        %42 = arith.select %40, %41, %23 : vector<64x128xi1>, vector<64x128xf32>
        %cst_19 = arith.constant dense<0x7F800000> : vector<64xf32>
        %43 = vector.multi_reduction <minimumf>, %38, %cst_19 [1] : vector<64x128xf32> to vector<64xf32>
        %44 = vector.shape_cast %43 : vector<64xf32> to vector<64x1xf32>
        %cst_20 = arith.constant dense<0x7F800000> : vector<64xf32>
        %45 = vector.multi_reduction <minimumf>, %42, %cst_20 [1] : vector<64x128xf32> to vector<64xf32>
        %46 = vector.shape_cast %45 : vector<64xf32> to vector<64x1xf32>
        %47 = arith.minimumf %44, %46 : vector<64x1xf32>
        %c1_i32_21 = arith.constant 1 : i32
        %48 = vector.broadcast %c1_i32_21 : i32 to vector<64x128xi32>
        %49 = arith.cmpi eq, %22, %48 : vector<64x128xi32>
        %50 = vector.shape_cast %47 : vector<64x1xf32> to vector<64x1xf32>
        %51 = vector.broadcast %50 : vector<64x1xf32> to vector<64x128xf32>
        %52 = arith.select %49, %51, %34 : vector<64x128xi1>, vector<64x128xf32>
        %53 = vector.broadcast %47 : vector<64x1xf32> to vector<64x128xf32>
        %54 = arith.cmpf oeq, %38, %53 : vector<64x128xf32>
        %cst_22 = arith.constant 3.000000e+30 : f32
        %55 = vector.broadcast %cst_22 : f32 to vector<64x128xf32>
        %56 = arith.select %54, %55, %38 : vector<64x128xi1>, vector<64x128xf32>
        %57 = vector.broadcast %47 : vector<64x1xf32> to vector<64x128xf32>
        %58 = arith.cmpf oeq, %42, %57 : vector<64x128xf32>
        %cst_23 = arith.constant 3.000000e+30 : f32
        %59 = vector.broadcast %cst_23 : f32 to vector<64x128xf32>
        %60 = arith.select %58, %59, %42 : vector<64x128xi1>, vector<64x128xf32>
        %cst_24 = arith.constant dense<0x7F800000> : vector<64xf32>
        %61 = vector.multi_reduction <minimumf>, %56, %cst_24 [1] : vector<64x128xf32> to vector<64xf32>
        %62 = vector.shape_cast %61 : vector<64xf32> to vector<64x1xf32>
        %cst_25 = arith.constant dense<0x7F800000> : vector<64xf32>
        %63 = vector.multi_reduction <minimumf>, %60, %cst_25 [1] : vector<64x128xf32> to vector<64xf32>
        %64 = vector.shape_cast %63 : vector<64xf32> to vector<64x1xf32>
        %65 = arith.minimumf %62, %64 : vector<64x1xf32>
        %c2_i32 = arith.constant 2 : i32
        %66 = vector.broadcast %c2_i32 : i32 to vector<64x128xi32>
        %67 = arith.cmpi eq, %22, %66 : vector<64x128xi32>
        %68 = vector.shape_cast %65 : vector<64x1xf32> to vector<64x1xf32>
        %69 = vector.broadcast %68 : vector<64x1xf32> to vector<64x128xf32>
        %70 = arith.select %67, %69, %52 : vector<64x128xi1>, vector<64x128xf32>
        %71 = vector.broadcast %65 : vector<64x1xf32> to vector<64x128xf32>
        %72 = arith.cmpf oeq, %56, %71 : vector<64x128xf32>
        %cst_26 = arith.constant 3.000000e+30 : f32
        %73 = vector.broadcast %cst_26 : f32 to vector<64x128xf32>
        %74 = arith.select %72, %73, %56 : vector<64x128xi1>, vector<64x128xf32>
        %75 = vector.broadcast %65 : vector<64x1xf32> to vector<64x128xf32>
        %76 = arith.cmpf oeq, %60, %75 : vector<64x128xf32>
        %cst_27 = arith.constant 3.000000e+30 : f32
        %77 = vector.broadcast %cst_27 : f32 to vector<64x128xf32>
        %78 = arith.select %76, %77, %60 : vector<64x128xi1>, vector<64x128xf32>
        %cst_28 = arith.constant dense<0x7F800000> : vector<64xf32>
        %79 = vector.multi_reduction <minimumf>, %74, %cst_28 [1] : vector<64x128xf32> to vector<64xf32>
        %80 = vector.shape_cast %79 : vector<64xf32> to vector<64x1xf32>
        %cst_29 = arith.constant dense<0x7F800000> : vector<64xf32>
        %81 = vector.multi_reduction <minimumf>, %78, %cst_29 [1] : vector<64x128xf32> to vector<64xf32>
        %82 = vector.shape_cast %81 : vector<64xf32> to vector<64x1xf32>
        %83 = arith.minimumf %80, %82 : vector<64x1xf32>
        %c3_i32 = arith.constant 3 : i32
        %84 = vector.broadcast %c3_i32 : i32 to vector<64x128xi32>
        %85 = arith.cmpi eq, %22, %84 : vector<64x128xi32>
        %86 = vector.shape_cast %83 : vector<64x1xf32> to vector<64x1xf32>
        %87 = vector.broadcast %86 : vector<64x1xf32> to vector<64x128xf32>
        %88 = arith.select %85, %87, %70 : vector<64x128xi1>, vector<64x128xf32>
        %c0_30 = arith.constant 0 : index
        %c0_31 = arith.constant 0 : index
        %89 = vector.load %arg7[%c0_30, %c0_31] : memref<64x128xf32, #tpu.memory_space<vmem>>, vector<64x128xf32>
        tpu.vector_store %arg7[%c0_30, %c0_31], %88 {strides = array<i32>} : memref<64x128xf32, #tpu.memory_space<vmem>>, vector<64x128xf32>,
      } else {
      }
    } else {
    }
    %c1_i32 = arith.constant 1 : i32
    %6 = arith.cmpi eq, %arg1, %c1_i32 : i32
    %7 = arith.extui %6 : i1 to i32
    %c0_i32_4 = arith.constant 0 : i32
    %8 = arith.cmpi ne, %7, %c0_i32_4 : i32
    scf.if %8 {
      %c0_i32_5 = arith.constant 0 : i32
      %9 = arith.cmpi eq, %arg2, %c0_i32_5 : i32
      %10 = arith.extui %9 : i1 to i32
      %c0_i32_6 = arith.constant 0 : i32
      %11 = arith.cmpi ne, %10, %c0_i32_6 : i32
      scf.if %11 {
        %cst_13 = arith.constant 0.000000e+00 : f32
        %25 = vector.broadcast %cst_13 : f32 to vector<64x128xf32>
        %c0_14 = arith.constant 0 : index
        %c0_15 = arith.constant 0 : index
        %26 = vector.load %arg6[%c0_14, %c0_15] : memref<64x128xf32, #tpu.memory_space<vmem>>, vector<64x128xf32>
        tpu.vector_store %arg6[%c0_14, %c0_15], %25 {strides = array<i32>} : memref<64x128xf32, #tpu.memory_space<vmem>>, vector<64x128xf32>,
        %cst_16 = arith.constant 0.000000e+00 : f32
        %27 = vector.broadcast %cst_16 : f32 to vector<64x128xf32>
        %c0_17 = arith.constant 0 : index
        %c0_18 = arith.constant 0 : index
        %28 = vector.load %arg8[%c0_17, %c0_18] : memref<64x128xf32, #tpu.memory_space<vmem>>, vector<64x128xf32>
        tpu.vector_store %arg8[%c0_17, %c0_18], %27 {strides = array<i32>} : memref<64x128xf32, #tpu.memory_space<vmem>>, vector<64x128xf32>,
      } else {
      }
      %c0_7 = arith.constant 0 : index
      %c3 = arith.constant 3 : index
      %12 = vector.load %arg7[%c0_7, %c3] : memref<64x128xf32, #tpu.memory_space<vmem>>, vector<64x1xf32>
      %13 = vector.broadcast %12 : vector<64x1xf32> to vector<64x128xf32>
      %14 = arith.subf %2, %13 : vector<64x128xf32>
      %15 = vector.shape_cast %14 : vector<64x128xf32> to vector<1x64x128xf32>
      %cst_8 = arith.constant dense<0x7F800000> : vector<1xf32>
      %16 = vector.multi_reduction <minimumf>, %15, %cst_8 [1, 2] : vector<1x64x128xf32> to vector<1xf32>
      %17 = vector.shape_cast %16 : vector<1xf32> to vector<1x1x1xf32>
      %18 = vector.extract %17[0, 0, 0] : f32 from vector<1x1x1xf32>
      %cst_9 = arith.constant 0.000000e+00 : f32
      %19 = arith.cmpf ole, %18, %cst_9 : f32
      %20 = arith.extui %19 : i1 to i32
      %c0_i32_10 = arith.constant 0 : i32
      %21 = arith.cmpi ne, %20, %c0_i32_10 : i32
      scf.if %21 {
        %25 = vector.broadcast %12 : vector<64x1xf32> to vector<64x128xf32>
        %26 = arith.cmpf ole, %2, %25 : vector<64x128xf32>
        %cst_13 = arith.constant 0.000000e+00 : f32
        %27 = vector.broadcast %cst_13 : f32 to vector<64x128xf32>
        %28 = arith.maximumf %2, %27 : vector<64x128xf32>
        %cst_14 = arith.constant 1.000000e-16 : f32
        %29 = vector.broadcast %cst_14 : f32 to vector<64x128xf32>
        %30 = arith.addf %28, %29 : vector<64x128xf32>
        %31 = math.rsqrt %30 : vector<64x128xf32>
        %cst_15 = arith.constant 0.000000e+00 : f32
        %32 = vector.broadcast %cst_15 : f32 to vector<64x128xf32>
        %33 = arith.select %26, %31, %32 : vector<64x128xi1>, vector<64x128xf32>
        %c0_16 = arith.constant 0 : index
        %c0_17 = arith.constant 0 : index
        %34 = vector.load %arg8[%c0_16, %c0_17] : memref<64x128xf32, #tpu.memory_space<vmem>>, vector<64x128xf32>
        %cst_18 = arith.constant dense<0.000000e+00> : vector<64xf32>
        %35 = vector.multi_reduction <add>, %33, %cst_18 [1] : vector<64x128xf32> to vector<64xf32>
        %36 = vector.shape_cast %35 : vector<64xf32> to vector<64x1xf32>
        %37 = vector.broadcast %36 : vector<64x1xf32> to vector<64x128xf32>
        %38 = arith.addf %34, %37 : vector<64x128xf32>
        %c0_19 = arith.constant 0 : index
        %c0_20 = arith.constant 0 : index
        %39 = vector.load %arg8[%c0_19, %c0_20] : memref<64x128xf32, #tpu.memory_space<vmem>>, vector<64x128xf32>
        tpu.vector_store %arg8[%c0_19, %c0_20], %38 {strides = array<i32>} : memref<64x128xf32, #tpu.memory_space<vmem>>, vector<64x128xf32>,
        %c0_21 = arith.constant 0 : index
        %c0_22 = arith.constant 0 : index
        %40 = vector.load %arg6[%c0_21, %c0_22] : memref<64x128xf32, #tpu.memory_space<vmem>>, vector<64x128xf32>
        %c0_23 = arith.constant 0 : index
        %c0_24 = arith.constant 0 : index
        %41 = vector.load %arg5[%c0_23, %c0_24] : memref<128x128xf32, #tpu.memory_space<vmem>>, vector<128x128xf32>
        %cst_25 = arith.constant dense<0.000000e+00> : vector<64x128xf32>
        %42 = tpu.matmul %33, %41, %cst_25 {dimension_numbers = #tpu.dot_dimension_numbers<[1], [0], [0], [1], [0, 0, 1, 1], [], []>} : vector<64x128xf32>, vector<128x128xf32>, vector<64x128xf32> -> vector<64x128xf32>
        %43 = arith.addf %40, %42 : vector<64x128xf32>
        %c0_26 = arith.constant 0 : index
        %c0_27 = arith.constant 0 : index
        %44 = vector.load %arg6[%c0_26, %c0_27] : memref<64x128xf32, #tpu.memory_space<vmem>>, vector<64x128xf32>
        tpu.vector_store %arg6[%c0_26, %c0_27], %43 {strides = array<i32>} : memref<64x128xf32, #tpu.memory_space<vmem>>, vector<64x128xf32>,
      } else {
      }
      %c1_i32_11 = arith.constant 1 : i32
      %22 = arith.cmpi eq, %arg2, %c1_i32_11 : i32
      %23 = arith.extui %22 : i1 to i32
      %c0_i32_12 = arith.constant 0 : i32
      %24 = arith.cmpi ne, %23, %c0_i32_12 : i32
      scf.if %24 {
        %c0_13 = arith.constant 0 : index
        %c0_14 = arith.constant 0 : index
        %25 = vector.load %arg6[%c0_13, %c0_14] : memref<64x128xf32, #tpu.memory_space<vmem>>, vector<64x128xf32>
        %c0_15 = arith.constant 0 : index
        %c0_16 = arith.constant 0 : index
        %26 = vector.load %arg8[%c0_15, %c0_16] : memref<64x128xf32, #tpu.memory_space<vmem>>, vector<64x1xf32>
        %cst_17 = arith.constant 1.000000e+00 : f32
        %27 = vector.broadcast %cst_17 : f32 to vector<64x1xf32>
        %28 = arith.divf %27, %26 : vector<64x1xf32>
        %29 = vector.broadcast %28 : vector<64x1xf32> to vector<64x128xf32>
        %30 = arith.mulf %25, %29 : vector<64x128xf32>
        %c0_18 = arith.constant 0 : index
        %c0_19 = arith.constant 0 : index
        %31 = vector.load %arg6[%c0_18, %c0_19] : memref<64x128xf32, #tpu.memory_space<vmem>>, vector<64x128xf32>
        tpu.vector_store %arg6[%c0_18, %c0_19], %30 {strides = array<i32>} : memref<64x128xf32, #tpu.memory_space<vmem>>, vector<64x128xf32>,
      } else {
      }
    } else {
    }
    return
  }
  func.func @transform_0(%arg0: i32, %arg1: i32, %arg2: i32) -> (i32, i32) {
    %c0_i32 = arith.constant 0 : i32
    %c0_i32_0 = arith.constant 0 : i32
    return %arg0, %c0_i32 : i32, i32
  }
  func.func @transform_1(%arg0: i32, %arg1: i32, %arg2: i32) -> (i32, i32) {
    %c0_i32 = arith.constant 0 : i32
    %c0_i32_0 = arith.constant 0 : i32
    return %c0_i32, %arg2 : i32, i32
  }
  func.func @transform_2(%arg0: i32, %arg1: i32, %arg2: i32) -> (i32, i32) {
    %0 = arith.muli %arg2, %arg1 : i32
    %c0_i32 = arith.constant 0 : i32
    %c0_i32_0 = arith.constant 0 : i32
    return %0, %c0_i32 : i32, i32
  }
  func.func @transform_3(%arg0: i32, %arg1: i32, %arg2: i32) -> (i32, i32) {
    %c0_i32 = arith.constant 0 : i32
    %c0_i32_0 = arith.constant 0 : i32
    return %arg0, %c0_i32 : i32, i32
  }
}

</mosaic_0001>

<bundles_post_ra>
// kernel: tpu_custom_call.1
= control target key start
LH: loop header
LB: loop body
LE: loop exit
PB: predicated region body
PF: predicated region fallthrough
CT: control target
= control target key end

     0   :  { %8 = vsyncpa [#allocation5], 0  ;;  %s2942_s0 = inlined_call_operand.vmem [shape: f32[128,8], index: 0, kind: input, shape index: {}]   ;;  %s2943_s1 = inlined_call_operand.vmem [shape: f32[8,256], index: 1, kind: input, shape index: {}]   ;;  %s2944_s2 = inlined_call_operand.hbm [shape: f32[256,128], index: 2, kind: input, shape index: {}]   ;;  %s2945_s3 = inlined_call_operand.hbm [shape: f32[128,128], index: 3, kind: output, shape index: {}]  }
   0x1   :  { %10 = vsyncpa [#allocation5 + $0x1], 0 }
   0x2   :  { %11 = vsyncpa [#allocation6], 0 }
   0x3   :  { %13 = vsyncpa [#allocation6 + $0x1], 0  ;;  %s1854_s12 = smov 0   ;;  %s1856_s13 = smov 0  }
   0x4   :  { %s1858_s14 = smov 0   ;;  %s1860_s15 = smov 0  }
   0x5   :  { %s1862_s16 = smov 0   ;;  %s1864_s17 = smov 0  }
   0x6   :  { %s1866_s18 = smov 0   ;;  %s1868_s19 = smov 0  }
   0x7   :  { %s1870_s20 = smov 0   ;;  %s1872_s21 = smov 0  }
   0x8   :  { %s1874_s22 = smov 0   ;;  %s1876_s23 = smov 0  }
   0x9   :  { %s1878_s24 = smov 0  }
   0xa LB: > { %2952 = sst [smem:[#allocation10_spill]] %s1811_s21  ;;  %s1391_s25 = sadd.s32 4294967295, %s1823_s24   ;;  %s1823_s24 = sphi %s1878_s24, %s19_s24   ;;  %s1819_s23 = sphi %s1876_s23, %s3004_s23   ;;  %s1815_s22 = sphi %s1874_s22, %s3003_s22   ;;  %s1811_s21 = sphi %s1872_s21, %s3013_s21   ;;  %s1807_s20 = sphi %s1870_s20, %s3001_s20   ;;  %s1803_s19 = sphi %s1868_s19, %s3000_s19   ;;  %s1799_s18 = sphi %s1866_s18, %s3012_s18   ;;  %s1795_s17 = sphi %s1864_s17, %s3011_s17   ;;  %s1791_s16 = sphi %s1862_s16, %s3010_s16   ;;  %s1787_s15 = sphi %s1860_s15, %s3009_s15   ;;  %s1783_s14 = sphi %s1858_s14, %s3008_s14   ;;  %s1779_s13 = sphi %s1856_s13, %s3007_s13   ;;  %s1775_s12 = sphi %s1854_s12, %s3006_s12  }
   0xb   : > { %2953 = sst [smem:[#allocation11_spill]] %s1815_s22  ;;  %s1392_s26 = sadd.s32 4294967294, %s1823_s24  }
   0xc   : > { %2954 = sst [smem:[#allocation12_spill]] %s1819_s23  ;;  %s31_s27 = sadd.s32 1, %s1811_s21 }
   0xd   : > { %s34_s28 = sadd.s32 1, %s1815_s22  ;;  %p32_p0 = scmp.ge.s32.totalorder %s31_s27, 2 }
   0xe   : > { %s38_s29 = sadd.s32 1, %s1819_s23  ;;  %s1926_s30 = smul.u32 %s1811_s21, %s1815_s22 }
   0xf   : > { %s99_s4 = sadd.s32 1, %s1795_s17  ;;  %s3015_s27 = smov (%p32_p0, %s31_s27), 0 }
  0x10   : > { %2955 = sst [smem:[#allocation13_spill]] %s3015_s27  ;;  %s3017_s28 = smov (!%p32_p0, %s34_s28), %s1815_s22 }
  0x11   : > { %p106_p1 = scmp.ne.s32.totalorder %s1795_s17, %s1791_s16  ;;  %p107_p2 = scmp.eq.s32.totalorder %s1823_s24, 0 }
  0x12   : > { %p36_p3 = scmp.ge.s32.totalorder %s3017_s28, 2  ;;  %p112_p4 = scmp.ne.s32.totalorder %s1791_s16, %s1787_s15 }
  0x13   : > { %p1937_p5 = por %p107_p2, %p106_p1  ;;  %p113_p6 = scmp.eq.s32.totalorder %s1391_s25, 0 }
  0x14   : > { %s3019_s28 = smov (%p36_p3, %s3017_s28), 0  ;;  %s3021_s29 = smov (!%p36_p3, %s38_s29), %s1819_s23 }
  0x15   : > { %2957 = sst [smem:[#allocation14_spill]] %s3019_s28  ;;  %s95_s6 = smul.u32 %s3019_s28, %s3015_s27 }
  0x16   : > { %p1946_p7 = por %p113_p6, %p112_p4  ;;  %p40_p8 = scmp.ge.s32.totalorder %s3021_s29, 2 }
  0x17   : > { %s125_s8 = sadd.s32 1, %s1783_s14  ;;  %s96_s9 = ssub.s32 %s1926_s30, %s95_s6 }
  0x18   : > { %p135_p9 = scmp.ne.s32.totalorder %s1783_s14, %s1779_s13  ;;  %s3023_s29 = smov (%p40_p8, %s3021_s29), 0 }
  0x19   : > { %2959 = sst [smem:[#allocation15_spill]] %s3023_s29  ;;  %p97_p10 = scmp.eq.s32.totalorder %s96_s9, 0 }
  0x1a   : > { %p136_p11 = scmp.eq.s32.totalorder %s1391_s25, 7  ;;  %s122_s10 = ssub.s32 %s1819_s23, %s3023_s29 }
  0x1b   : > { %p141_p12 = scmp.ne.s32.totalorder %s1779_s13, %s1775_s12  ;;  %p123_p13 = scmp.eq.s32.totalorder %s122_s10, 0 }
  0x1c   : > { %s1961_s11 = scalar_select %p97_p10, %s1795_s17, %s99_s4  }
  0x1d   : > { %p1963_p0 = por %p136_p11, %p135_p9  ;;  %p142_p1 = scmp.eq.s32.totalorder %s1392_s26, 7 }
  0x1e   : > { %2960 = sst [smem:[#allocation16_spill]] %s1961_s11  ;;  %p1499_p3 = scmp.lt.s32.totalorder %s1823_s24, 8 }
  0x1f   : > { %s1970_s6 = scalar_select %p123_p13, %s1783_s14, %s125_s8  }
  0x20   : > { %p1972_p2 = por %p142_p1, %p141_p12  ;;  %s178_s25 = sand.u32 1, %s1795_s17  }
  0x21   : > { %s1430_s4 = sshll.u32 %s1926_s30, 7  ;;  %s1395_s9 = sshll.u32 %s178_s25, 7 }
  0x22   : > { %s188_s27 = scalar_lea.hbm %s2944_s2, %s1430_s4  ;;  %s182_s22 = scalar_lea.vmem [#allocation4], %s1395_s9 }
  0x23   : > { %s189_s23 = sshll.u32 %s188_s27, 4  ;;  %s191_s21 = sshll.u32 %s182_s22, 4  ;;  %s190_s23 = int_to_ptr.hbm [resolvable:$true] %s189_s23  ;;  %s192_s21 = int_to_ptr.vmem [resolvable:$true] %s191_s21 }
  0x24   : > { %p1492_p4 = pnand %p1499_p3, %p1937_p5  ;;  %p1398_p6 = scmp.ge.s32.totalorder %s1823_s24, 1 }
  0x25   : > { %p199_p8 = scmp.lt.s32.totalorder %s1823_s24, 9  ;;  %s179_s26 = scalar_lea.sflag [#allocation5], %s178_s25 }
  0x26   : > { %s1825_s8 = smov 128   ;;  %s1826_s11 = smov 8  }
  0x27   : > { %1494 = dma.hbm_to_vmem [thread:$0]  (!%p1492_p4), %s190_s23, 2048, %s192_s21, %s179_s26, %s1825_s8, %s1825_s8, %s1826_s11  }
  0x28   : > { %p200_p9 = pnand %p1398_p6, %p199_p8 }
  0x29   : > { %s205_s30 = sand.u32 (!%p200_p9), 1, %s1791_s16  }
  0x2a   : > { %203 = sbr.rel (%p200_p9) target bundleno = 1816 (0x718), region = 32  ;;  %s1399_s29 = sshll.u32 (!%p200_p9), %s205_s30, 7 }
  0x2b   : > { %s206_s4 = scalar_lea.sflag (!%p200_p9), [#allocation5], %s205_s30  ;;  %s1987_s27 = scalar_lea.vmem (!%p200_p9), [#allocation4], %s1399_s29 }
  0x2f   : > { %1766 = dma.done.wait (%p1946_p7), %s206_s4, 2048  }
  0x30   : > { %1768 = vsyncadd (%p1946_p7), %s206_s4, 4294965248  ;;  %p248_p5 = scmp.lt.s32.totalorder %s1799_s18, 1  ;;  %s1401_s21 = sshll.u32 %s1807_s20, 3  ;;  %vm264_vm0 = vcmask 64512  }
  0x31   : > { %p243_p10 = scmp.lt.s32.totalorder %s1401_s21, 15  ;;  %s239_s22 = sand.u32 1, %s1779_s13  }
  0x32   : > { %s249_s23 = scalar_select %p248_p5, %s1799_s18, 1 }
  0x33   : > { %s3025_s21 = smov (!%p243_p10, %s1401_s21), 15  ;;  %s1999_s11 = sshll.u32 %s239_s22, 6 }
  0x34   : > { %s1403_s5 = sshll.u32 %s249_s23, 3  ;;  %s1402_s10 = sshll.u32 %s3025_s21, 3 }
  0x35   : > { %s251_s7 = scalar_lea.vmem %s2943_s1, %s1403_s5  ;;  %s246_s30 = scalar_lea.vmem %s2942_s0, %s1402_s10 }
  0x36   : > { %v263_v0 = vld [vmem:[%s251_s7] sm:$0xff]  ;;  %v261_v2 = vld [vmem:[%s246_s30 + $0x30] sm:$0xff]  ;;  %v260_v5 = vld [vmem:[%s246_s30 + $0x28] sm:$0xff]  ;;  %s2032_s29 = scalar_lea.vmem [#allocation7], %s1999_s11  ;;  %p1412_p7 = scmp.ne.s32.totalorder %s1803_s19, 0 }
  0x37   : > { %v259_v1 = vld [vmem:[%s246_s30 + $0x20] sm:$0xff]  ;;  %1433 = vmatpush.msra.mxu2 %v263_v0  ;;  %1434 = vmatpush.msra.mxu3 %v263_v0  ;;  %v257_v4 = vld [vmem:[%s246_s30 + $0x10] sm:$0xff]  ;;  %v262_v6 = vld [vmem:[%s246_s30 + $0x38] sm:$0xff]  ;;  %p1413_p11 = scmp.ne.s32.totalorder (!%p1412_p7), %s1799_s18, 0 }
  0x38   : > { %v255_v3 = vld [vmem:[%s246_s30] sm:$0xff]  ;;  %1408 = vmatmul.msk.f32.vlgmr.msra.gmra.mxu2 %vm264_vm0, %v259_v1  ;;  %1410 = vmatmul.msk.f32.vlgmr.msra.gmra.mxu3 %vm264_vm0, %v261_v2  ;;  %v256_v7 = vld [vmem:[%s246_s30 + $0x8] sm:$0xff]  ;;  %v258_v8 = vld [vmem:[%s246_s30 + $0x18] sm:$0xff] }
  0x39   : > { %304 = vmatpush.msra.mxu0 %v263_v0  ;;  %1432 = vmatpush.msra.mxu1 %v263_v0 }
  0x3a   : > { %1404 = vmatmul.msk.f32.vlgmr.msra.gmra.mxu0 %vm264_vm0, %v255_v3  ;;  %1406 = vmatmul.msk.f32.vlgmr.msra.gmra.mxu1 %vm264_vm0, %v257_v4 }
  0x40   : > { %1409 = vmatmul.msk.f32.gmra.mxu2 %vm264_vm0, %v260_v5  ;;  %1411 = vmatmul.msk.f32.gmra.mxu3 %vm264_vm0, %v262_v6 }
  0x42   : > { %1405 = vmatmul.msk.f32.gmra.mxu0 %vm264_vm0, %v256_v7  ;;  %1407 = vmatmul.msk.f32.gmra.mxu1 %vm264_vm0, %v258_v8 }
  0xb7   : > { %v2015_v9 = vpop.f32.mrf.mxu0  ;;  %v2017_v10 = vpop.f32.mrf.mxu1 }
  0xbb   : > { %v2019_v11 = vpop.f32.mrf.mxu2  ;;  %v2021_v12 = vpop.f32.mrf.mxu3 }
  0xbf   : > { %v2023_v13 = vpop.f32.mrf.mxu0  ;;  %v2025_v14 = vpop.f32.mrf.mxu1  ;;  %333 = sbr.rel (%p1412_p7) target bundleno = 1115 (0x45b), region = 40 }
  0xc3   : > { %v2027_v15 = vpop.f32.mrf.mxu2  ;;  %v2029_v16 = vpop.f32.mrf.mxu3 }
  0xc4   : > { %337 = sbr.rel (%p1413_p11) target bundleno = 210 (0xd2), region = 44 }
  0xc9   : > { %v1827_v17 = vmov 3e+30  }
  0xca   : > { %338 = vst [vmem:[#allocation2 + $0x30] sm:$0xff] %v1827_v17 }
  0xcb   : > { %339 = vst [vmem:[#allocation2] sm:$0xff] %v1827_v17 }
  0xcc   : > { %340 = vst [vmem:[#allocation2 + $0x18] sm:$0xff] %v1827_v17 }
  0xcd   : > { %341 = vst [vmem:[#allocation2 + $0x10] sm:$0xff] %v1827_v17 }
  0xce   : > { %342 = vst [vmem:[#allocation2 + $0x8] sm:$0xff] %v1827_v17 }
  0xcf   : > { %343 = vst [vmem:[#allocation2 + $0x20] sm:$0xff] %v1827_v17 }
  0xd0   : > { %344 = vst [vmem:[#allocation2 + $0x28] sm:$0xff] %v1827_v17 }
  0xd1   : > { %345 = vst [vmem:[#allocation2 + $0x38] sm:$0xff] %v1827_v17 }
  0xd2 PF: > { %v346_v19 = vld [vmem:[#allocation2 + $0x30] sm:$0xff]  ;;  %v1828_v20 = vmov 3   ;;  %v347_v23 = vld [vmem:[#allocation2] sm:$0xff] }
  0xd3   : > { %v348_v18 = vld [vmem:[#allocation2 + $0x18] sm:$0xff]  ;;  %1615 = vset.pattern.permute.xlu1 %v1828_v20  ;;  %1614 = vset.pattern.permute.xlu0 %v1828_v20 }
  0xd4   : > { %366 = vperm.xlu1 %1615, %v348_v18   ;;  %356 = vperm.xlu0 %1614, %v346_v19   ;;  %v349_v22 = vld [vmem:[#allocation2 + $0x10] sm:$0xff] }
  0xd5   : > { %v350_v21 = vld [vmem:[#allocation2 + $0x8] sm:$0xff]  ;;  %1616 = vset.pattern.permute.xlu2 %v1828_v20 }
  0xd6   : > { %376 = vperm.xlu2 %1616, %v350_v21   ;;  %v351_v24 = vld [vmem:[#allocation2 + $0x20] sm:$0xff] }
  0xd7   : > { %v352_v26 = vld [vmem:[#allocation2 + $0x28] sm:$0xff] }
  0xd8   : > { %v353_v25 = vld [vmem:[#allocation2 + $0x38] sm:$0xff] }
  0xdc   : > { %371 = vperm.xlu1 %1615, %v349_v22   ;;  %361 = vperm.xlu0 %1614, %v347_v23  }
  0xde   : > { %381 = vperm.xlu2 %1616, %v351_v24  }
  0xe4   : > { %391 = vperm.xlu1 %1615, %v353_v25   ;;  %386 = vperm.xlu0 %1614, %v352_v26  }
 0x130   : > { %v377_v27 = vpop.permute.xlu2 %376 }
 0x131   : > { %v398_v35 = vsub.f32 %v2019_v11, %v377_v27 }
 0x138   : > { %v382_v32 = vpop.permute.xlu2 %381 }
 0x139   : > { %v399_v33 = vsub.f32 %v2027_v15, %v382_v32 }
 0x146   : > { %v367_v28 = vpop.permute.xlu1 %366  ;;  %v357_v29 = vpop.permute.xlu0 %356 }
 0x147   : > { %v394_v36 = vsub.f32 %v2015_v9, %v357_v29  ;;  %v396_v37 = vsub.f32 %v2017_v10, %v367_v28 }
 0x149   : > { %v402_v44 = vmin.f32 %v394_v36, %v398_v35 }
 0x14e   : > { %v372_v30 = vpop.permute.xlu1 %371  ;;  %v362_v31 = vpop.permute.xlu0 %361 }
 0x14f   : > { %v395_v34 = vsub.f32 %v2023_v13, %v362_v31  ;;  %v397_v40 = vsub.f32 %v2025_v14, %v372_v30 }
 0x151   : > { %v403_v41 = vmin.f32 %v395_v34, %v399_v33 }
 0x153   : > { %v406_v47 = vmin.f32 %v402_v44, %v403_v41 }
 0x156   : > { %v392_v38 = vpop.permute.xlu1 %391  ;;  %v387_v39 = vpop.permute.xlu0 %386 }
 0x157   : > { %v401_v42 = vsub.f32 %v2029_v16, %v392_v38  ;;  %v400_v43 = vsub.f32 %v2021_v12, %v387_v39 }
 0x159   : > { %v405_v45 = vmin.f32 %v397_v40, %v401_v42  ;;  %v404_v46 = vmin.f32 %v396_v37, %v400_v43 }
 0x15b   : > { %v407_v48 = vmin.f32 %v404_v46, %v405_v45 }
 0x15d   : > { %v408_v49 = vmin.f32 %v406_v47, %v407_v48 }
 0x15f   : > { %409 = vmin.xlane.f32.xlu2 %v408_v49 }
 0x1d2   : > { %v410_v50 = vpop.xlane.xlu2 %409 }
 0x1d3   : > { %v411_v51 = vrot.slane %v410_v50, 4 }
 0x1d5   : > { %v412_v52 = vmin.f32 %v410_v50, %v411_v51 }
 0x1d7   : > { %v413_v53 = vrot.slane %v412_v52, 2 }
 0x1d9   : > { %v414_v54 = vmin.f32 %v412_v52, %v413_v53 }
 0x1db   : > { %v415_v55 = vrot.slane %v414_v54, 1 }
 0x1dd   : > { %v416_v56 = vmin.f32 %v414_v54, %v415_v55 }
 0x1df   : > { %1483 = vpush %v416_v56 }
 0x210   : > { %s1484_s4 = spop %1483 }
 0x211   : > { %p418_p12 = scmp.lt.f32.partialorder %s1484_s4, 0.0 }
 0x212   : > { %440 = vmin.xlane.f32.xlu2 (%p418_p12), %v2019_v11  ;;  %436 = vmin.xlane.f32.xlu1 (%p418_p12), %v2017_v10  ;;  %v2050_v57 = vld [vmem:[#allocation2 + $0x30] sm:$0xff] (%p418_p12)  ;;  %v2055_v58 = vld [vmem:[#allocation2 + $0x18] sm:$0xff] (%p418_p12)  ;;  %v425_v60 = vld [vmem:[#allocation2] sm:$0xff] (%p418_p12)  ;;  %v422_v53 = vlaneseq (%p418_p12) }
 0x213   : > { %421 = sbr.rel (!%p418_p12) target bundleno = 1115 (0x45b), region = 48  ;;  %432 = vmin.xlane.f32.xlu0 (%p418_p12), %v2015_v9  ;;  %v2057_v59 = vld [vmem:[#allocation2 + $0x10] sm:$0xff] (%p418_p12)  ;;  %v2061_v61 = vld [vmem:[#allocation2 + $0x20] sm:$0xff] (%p418_p12)  ;;  %v2063_v62 = vld [vmem:[#allocation2 + $0x28] sm:$0xff] (%p418_p12) }
 0x214   : > { %v2065_v63 = vld [vmem:[#allocation2 + $0x8] sm:$0xff] (%p418_p12)  ;;  %v2070_v0 = vld [vmem:[#allocation2 + $0x38] sm:$0xff] (%p418_p12) }
 0x21a   : > { %442 = vmin.xlane.f32.xlu2 %v2027_v15  ;;  %438 = vmin.xlane.f32.xlu1 %v2025_v14 }
 0x21b   : > { %434 = vmin.xlane.f32.xlu0 %v2023_v13 }
 0x222   : > { %446 = vmin.xlane.f32.xlu1 %v2029_v16  ;;  %448 = vmin.xlane.f32.xlu2 %v2050_v57 }
 0x223   : > { %444 = vmin.xlane.f32.xlu0 %v2021_v12 }
 0x22a   : > { %452 = vmin.xlane.f32.xlu1 %v2055_v58  ;;  %454 = vmin.xlane.f32.xlu2 %v2057_v59 }
 0x22b   : > { %450 = vmin.xlane.f32.xlu0 %v425_v60 }
 0x232   : > { %458 = vmin.xlane.f32.xlu1 %v2061_v61  ;;  %460 = vmin.xlane.f32.xlu2 %v2063_v62 }
 0x233   : > { %456 = vmin.xlane.f32.xlu0 %v2065_v63 }
 0x23b   : > { %462 = vmin.xlane.f32.xlu0 %v2070_v0 }
 0x285   : > { %v441_v1 = vpop.xlane.xlu2 %440  ;;  %v437_v2 = vpop.xlane.xlu1 %436 }
 0x286   : > { %v433_v3 = vpop.xlane.xlu0 %432 }
 0x28d   : > { %v443_v4 = vpop.xlane.xlu2 %442  ;;  %v439_v5 = vpop.xlane.xlu1 %438 }
 0x28e   : > { %v435_v6 = vpop.xlane.xlu0 %434 }
 0x295   : > { %v447_v7 = vpop.xlane.xlu1 %446  ;;  %v449_v8 = vpop.xlane.xlu2 %448 }
 0x296   : > { %v445_v17 = vpop.xlane.xlu0 %444  ;;  %v2073_v18 = vmin.f32 %v433_v3, %v449_v8 }
 0x298   : > { %vm481_vm1 = vcmp.eq.f32.partialorder %v2015_v9, %v2073_v18  ;;  %vm497_vm8 = vcmp.eq.f32.partialorder %v2050_v57, %v2073_v18 }
 0x299   : > { %v2078_v19 = vsel %vm481_vm1, 3e+30, %v2015_v9  ;;  %v2137_v40 = vsel %vm497_vm8, 3e+30, %v2050_v57  ;;  %v2183_v57 = vand.u32 127, %v422_v53 }
 0x29a   : > { %513 = vmin.xlane.f32.xlu1 %v2078_v19 }
 0x29b   : > { %vm472_vm1 = vcmp.eq.s32.totalorder %v2183_v57, 0 }
 0x29d   : > { %v453_v20 = vpop.xlane.xlu1 %452  ;;  %v455_v21 = vpop.xlane.xlu2 %454 }
 0x29e   : > { %v2081_v22 = vmin.f32 %v437_v2, %v453_v20  ;;  %v451_v23 = vpop.xlane.xlu0 %450  ;;  %v2083_v24 = vmin.f32 %v439_v5, %v455_v21 }
 0x29f   : > { %v2085_v25 = vmin.f32 %v435_v6, %v451_v23 }
 0x2a0   : > { %vm483_vm2 = vcmp.eq.f32.partialorder %v2017_v10, %v2081_v22  ;;  %vm484_vm3 = vcmp.eq.f32.partialorder %v2025_v14, %v2083_v24  ;;  %vm500_vm11 = vcmp.eq.f32.partialorder %v2057_v59, %v2083_v24  ;;  %vm499_vm13 = vcmp.eq.f32.partialorder %v2055_v58, %v2081_v22 }
 0x2a1   : > { %v2092_v26 = vsel %vm483_vm2, 3e+30, %v2017_v10  ;;  %vm482_vm4 = vcmp.eq.f32.partialorder %v2023_v13, %v2085_v25  ;;  %v2097_v27 = vsel %vm484_vm3, 3e+30, %v2025_v14  ;;  %vm498_vm9 = vcmp.eq.f32.partialorder %v425_v60, %v2085_v25 }
 0x2a2   : > { %517 = vmin.xlane.f32.xlu0 %v2092_v26  ;;  %v2101_v28 = vsel %vm482_vm4, 3e+30, %v2023_v13  ;;  %519 = vmin.xlane.f32.xlu1 %v2097_v27  ;;  %v2139_v41 = vsel %vm498_vm9, 3e+30, %v425_v60  ;;  %v2154_v43 = vsel %vm500_vm11, 3e+30, %v2057_v59 }
 0x2a3   : > { %515 = vmin.xlane.f32.xlu2 %v2101_v28  ;;  %v2160_v45 = vsel %vm499_vm13, 3e+30, %v2055_v58  ;;  %vm553_vm2 = vcmp.eq.s32.totalorder %v2183_v57, 1 }
 0x2a5   : > { %v459_v29 = vpop.xlane.xlu1 %458  ;;  %v461_v30 = vpop.xlane.xlu2 %460 }
 0x2a6   : > { %v2105_v31 = vmin.f32 %v443_v4, %v459_v29  ;;  %v457_v32 = vpop.xlane.xlu0 %456  ;;  %v2107_v33 = vmin.f32 %v445_v17, %v461_v30 }
 0x2a7   : > { %v2109_v34 = vmin.f32 %v441_v1, %v457_v32 }
 0x2a8   : > { %vm486_vm5 = vcmp.eq.f32.partialorder %v2027_v15, %v2105_v31  ;;  %vm487_vm6 = vcmp.eq.f32.partialorder %v2021_v12, %v2107_v33  ;;  %vm503_vm14 = vcmp.eq.f32.partialorder %v2063_v62, %v2107_v33  ;;  %vm502_vm0 = vcmp.eq.f32.partialorder %v2061_v61, %v2105_v31 }
 0x2a9   : > { %v2116_v35 = vsel %vm486_vm5, 3e+30, %v2027_v15  ;;  %vm485_vm7 = vcmp.eq.f32.partialorder %v2019_v11, %v2109_v34  ;;  %v2121_v36 = vsel %vm487_vm6, 3e+30, %v2021_v12  ;;  %vm501_vm12 = vcmp.eq.f32.partialorder %v2065_v63, %v2109_v34 }
 0x2aa   : > { %523 = vmin.xlane.f32.xlu0 %v2116_v35  ;;  %v2125_v37 = vsel %vm485_vm7, 3e+30, %v2019_v11  ;;  %525 = vmin.xlane.f32.xlu1 %v2121_v36  ;;  %v2157_v44 = vsel %vm501_vm12, 3e+30, %v2065_v63  ;;  %v2172_v46 = vsel %vm503_vm14, 3e+30, %v2063_v62 }
 0x2ab   : > { %521 = vmin.xlane.f32.xlu2 %v2125_v37  ;;  %v2178_v48 = vsel %vm502_vm0, 3e+30, %v2061_v61  ;;  %v473_v63 = vsel %vm472_vm1, %v2073_v18, 3e+30  ;;  %v475_v18 = vsel %vm472_vm1, %v2081_v22, 3e+30 }
 0x2ac   : > { %v477_v20 = vsel %vm472_vm1, %v2109_v34, 3e+30 }
 0x2ae   : > { %v463_v38 = vpop.xlane.xlu0 %462 }
 0x2af   : > { %v2132_v39 = vmin.f32 %v447_v7, %v463_v38 }
 0x2b1   : > { %vm488_vm10 = vcmp.eq.f32.partialorder %v2029_v16, %v2132_v39  ;;  %vm504_vm15 = vcmp.eq.f32.partialorder %v2070_v0, %v2132_v39 }
 0x2b2   : > { %v2142_v42 = vsel %vm488_vm10, 3e+30, %v2029_v16  ;;  %529 = vmin.xlane.f32.xlu0 %v2137_v40  ;;  %531 = vmin.xlane.f32.xlu1 %v2139_v41  ;;  %v2175_v47 = vsel %vm504_vm15, 3e+30, %v2070_v0  ;;  %v474_v0 = vsel %vm472_vm1, %v2085_v25, 3e+30 }
 0x2b3   : > { %527 = vmin.xlane.f32.xlu2 %v2142_v42 }
 0x2ba   : > { %535 = vmin.xlane.f32.xlu0 %v2154_v43  ;;  %537 = vmin.xlane.f32.xlu1 %v2157_v44 }
 0x2bb   : > { %533 = vmin.xlane.f32.xlu2 %v2160_v45 }
 0x2c2   : > { %541 = vmin.xlane.f32.xlu0 %v2172_v46  ;;  %543 = vmin.xlane.f32.xlu1 %v2175_v47 }
 0x2c3   : > { %539 = vmin.xlane.f32.xlu2 %v2178_v48 }
 0x30d   : > { %v514_v49 = vpop.xlane.xlu1 %513 }
 0x315   : > { %v518_v50 = vpop.xlane.xlu0 %517  ;;  %v520_v51 = vpop.xlane.xlu1 %519 }
 0x316   : > { %v516_v52 = vpop.xlane.xlu2 %515 }
 0x31d   : > { %v524_v54 = vpop.xlane.xlu0 %523  ;;  %v526_v55 = vpop.xlane.xlu1 %525 }
 0x31e   : > { %v522_v56 = vpop.xlane.xlu2 %521 }
 0x325   : > { %v530_v58 = vpop.xlane.xlu0 %529  ;;  %v532_v59 = vpop.xlane.xlu1 %531 }
 0x326   : > { %v2187_v60 = vmin.f32 %v514_v49, %v530_v58  ;;  %v546_v61 = vmin.f32 %v516_v52, %v532_v59  ;;  %v528_v62 = vpop.xlane.xlu2 %527  ;;  %v479_v49 = vsel %vm472_vm1, %v2107_v33, 3e+30 }
 0x328   : > { %v2198_v1 = vsel %vm553_vm2, %v2187_v60, %v473_v63  ;;  %v2202_v2 = vsel %vm553_vm2, %v546_v61, %v474_v0  ;;  %vm562_vm3 = vcmp.eq.f32.partialorder %v2078_v19, %v2187_v60  ;;  %vm563_vm4 = vcmp.eq.f32.partialorder %v2101_v28, %v546_v61 }
 0x329   : > { %v2208_v3 = vsel %vm562_vm3, 3e+30, %v2078_v19  ;;  %v2211_v4 = vsel %vm563_vm4, 3e+30, %v2101_v28  ;;  %v476_v19 = vsel %vm472_vm1, %v2083_v24, 3e+30  ;;  %vm579_vm11 = vcmp.eq.f32.partialorder %v2139_v41, %v546_v61 }
 0x32a   : > { %594 = vmin.xlane.f32.xlu2 %v2208_v3  ;;  %596 = vmin.xlane.f32.xlu0 %v2211_v4  ;;  %vm578_vm13 = vcmp.eq.f32.partialorder %v2137_v40, %v2187_v60  ;;  %vm634_vm3 = vcmp.eq.s32.totalorder %v2183_v57, 2 }
 0x32d   : > { %v536_v5 = vpop.xlane.xlu0 %535  ;;  %v538_v6 = vpop.xlane.xlu1 %537 }
 0x32e   : > { %v548_v7 = vmin.f32 %v520_v51, %v536_v5  ;;  %v549_v8 = vmin.f32 %v522_v56, %v538_v6  ;;  %v534_v17 = vpop.xlane.xlu2 %533 }
 0x32f   : > { %v547_v21 = vmin.f32 %v518_v50, %v534_v17 }
 0x330   : > { %v2226_v23 = vsel %vm553_vm2, %v548_v7, %v476_v19  ;;  %v2230_v25 = vsel %vm553_vm2, %v549_v8, %v477_v20  ;;  %vm565_vm5 = vcmp.eq.f32.partialorder %v2097_v27, %v548_v7  ;;  %vm566_vm6 = vcmp.eq.f32.partialorder %v2125_v37, %v549_v8 }
 0x331   : > { %v2236_v22 = vsel %vm553_vm2, %v547_v21, %v475_v18  ;;  %v2239_v24 = vsel %vm565_vm5, 3e+30, %v2097_v27  ;;  %v2242_v28 = vsel %vm566_vm6, 3e+30, %v2125_v37  ;;  %vm564_vm7 = vcmp.eq.f32.partialorder %v2092_v26, %v547_v21 }
 0x332   : > { %600 = vmin.xlane.f32.xlu2 %v2239_v24  ;;  %602 = vmin.xlane.f32.xlu0 %v2242_v28  ;;  %v2248_v29 = vsel %vm564_vm7, 3e+30, %v2092_v26  ;;  %v478_v37 = vsel %vm472_vm1, %v2105_v31, 3e+30  ;;  %v480_v26 = vsel %vm472_vm1, %v2132_v39, 3e+30  ;;  %vm580_vm12 = vcmp.eq.f32.partialorder %v2160_v45, %v547_v21 }
 0x333   : > { %598 = vmin.xlane.f32.xlu1 %v2248_v29  ;;  %vm582_vm14 = vcmp.eq.f32.partialorder %v2157_v44, %v549_v8  ;;  %vm581_vm0 = vcmp.eq.f32.partialorder %v2154_v43, %v548_v7 }
 0x335   : > { %v542_v30 = vpop.xlane.xlu0 %541  ;;  %v544_v32 = vpop.xlane.xlu1 %543 }
 0x336   : > { %v551_v34 = vmin.f32 %v526_v55, %v542_v30  ;;  %v552_v38 = vmin.f32 %v528_v62, %v544_v32  ;;  %v540_v27 = vpop.xlane.xlu2 %539 }
 0x337   : > { %v550_v50 = vmin.f32 %v524_v54, %v540_v27 }
 0x338   : > { %v2262_v51 = vsel %vm553_vm2, %v551_v34, %v479_v49  ;;  %v2266_v52 = vsel %vm553_vm2, %v552_v38, %v480_v26  ;;  %vm568_vm8 = vcmp.eq.f32.partialorder %v2121_v36, %v551_v34  ;;  %vm569_vm9 = vcmp.eq.f32.partialorder %v2142_v42, %v552_v38 }
 0x339   : > { %v2272_v31 = vsel %vm553_vm2, %v550_v50, %v478_v37  ;;  %v2275_v33 = vsel %vm568_vm8, 3e+30, %v2121_v36  ;;  %v2278_v39 = vsel %vm569_vm9, 3e+30, %v2142_v42  ;;  %vm567_vm10 = vcmp.eq.f32.partialorder %v2116_v35, %v550_v50 }
 0x33a   : > { %606 = vmin.xlane.f32.xlu2 %v2275_v33  ;;  %608 = vmin.xlane.f32.xlu0 %v2278_v39  ;;  %v2284_v53 = vsel %vm567_vm10, 3e+30, %v2116_v35  ;;  %v2292_v36 = vsel %vm579_vm11, 3e+30, %v2139_v41  ;;  %v2295_v42 = vsel %vm580_vm12, 3e+30, %v2160_v45  ;;  %vm583_vm15 = vcmp.eq.f32.partialorder %v2178_v48, %v550_v50 }
 0x33b   : > { %604 = vmin.xlane.f32.xlu1 %v2284_v53  ;;  %v2300_v35 = vsel %vm578_vm13, 3e+30, %v2137_v40  ;;  %v2307_v41 = vsel %vm582_vm14, 3e+30, %v2157_v44  ;;  %v2310_v45 = vsel %vm583_vm15, 3e+30, %v2178_v48  ;;  %vm585_vm1 = vcmp.eq.f32.partialorder %v2175_v47, %v552_v38 }
 0x33c   : > { %v2315_v40 = vsel %vm581_vm0, 3e+30, %v2154_v43  ;;  %vm584_vm2 = vcmp.eq.f32.partialorder %v2172_v46, %v551_v34  ;;  %v2321_v54 = vsel %vm585_vm1, 3e+30, %v2175_v47 }
 0x33d   : > { %v2325_v44 = vsel %vm584_vm2, 3e+30, %v2172_v46 }
 0x342   : > { %612 = vmin.xlane.f32.xlu2 %v2292_v36  ;;  %614 = vmin.xlane.f32.xlu0 %v2295_v42 }
 0x343   : > { %610 = vmin.xlane.f32.xlu1 %v2300_v35 }
 0x34a   : > { %618 = vmin.xlane.f32.xlu2 %v2307_v41  ;;  %620 = vmin.xlane.f32.xlu0 %v2310_v45 }
 0x34b   : > { %616 = vmin.xlane.f32.xlu1 %v2315_v40 }
 0x352   : > { %624 = vmin.xlane.f32.xlu2 %v2321_v54 }
 0x353   : > { %622 = vmin.xlane.f32.xlu1 %v2325_v44 }
 0x39d   : > { %v597_v48 = vpop.xlane.xlu0 %596  ;;  %v595_v55 = vpop.xlane.xlu2 %594 }
 0x3a5   : > { %v603_v43 = vpop.xlane.xlu0 %602  ;;  %v601_v56 = vpop.xlane.xlu2 %600 }
 0x3a6   : > { %v599_v58 = vpop.xlane.xlu1 %598 }
 0x3ad   : > { %v609_v59 = vpop.xlane.xlu0 %608  ;;  %v607_v60 = vpop.xlane.xlu2 %606 }
 0x3ae   : > { %v605_v61 = vpop.xlane.xlu1 %604 }
 0x3b5   : > { %v615_v62 = vpop.xlane.xlu0 %614  ;;  %v613_v47 = vpop.xlane.xlu2 %612 }
 0x3b6   : > { %v628_v63 = vmin.f32 %v599_v58, %v615_v62  ;;  %v611_v0 = vpop.xlane.xlu1 %610  ;;  %v627_v5 = vmin.f32 %v597_v48, %v613_v47 }
 0x3b7   : > { %v626_v6 = vmin.f32 %v595_v55, %v611_v0 }
 0x3b8   : > { %v2332_v46 = vsel %vm634_vm3, %v628_v63, %v2236_v22  ;;  %v2337_v7 = vsel %vm634_vm3, %v627_v5, %v2202_v2  ;;  %vm645_vm4 = vcmp.eq.f32.partialorder %v2248_v29, %v628_v63  ;;  %vm644_vm5 = vcmp.eq.f32.partialorder %v2211_v4, %v627_v5 }
 0x3b9   : > { %v2344_v8 = vsel %vm634_vm3, %v626_v6, %v2198_v1  ;;  %v653_v17 = vsel %vm645_vm4, 3e+30, %v2248_v29  ;;  %vm643_vm6 = vcmp.eq.f32.partialorder %v2208_v3, %v626_v6  ;;  %v652_v18 = vsel %vm644_vm5, 3e+30, %v2211_v4 }
 0x3ba   : > { %679 = vmin.xlane.f32.xlu2 %v653_v17  ;;  %v651_v19 = vsel %vm643_vm6, 3e+30, %v2208_v3  ;;  %677 = vmin.xlane.f32.xlu1 %v652_v18  ;;  %vm659_vm10 = vcmp.eq.f32.partialorder %v2300_v35, %v626_v6  ;;  %vm661_vm14 = vcmp.eq.f32.partialorder %v2295_v42, %v628_v63  ;;  %vm660_vm15 = vcmp.eq.f32.partialorder %v2292_v36, %v627_v5 }
 0x3bb   : > { %675 = vmin.xlane.f32.xlu0 %v651_v19  ;;  %vm715_vm4 = vcmp.eq.s32.totalorder %v2183_v57, 3 }
 0x3bd   : > { %v621_v2 = vpop.xlane.xlu0 %620  ;;  %v619_v20 = vpop.xlane.xlu2 %618 }
 0x3be   : > { %v631_v21 = vmin.f32 %v605_v61, %v621_v2  ;;  %v617_v22 = vpop.xlane.xlu1 %616  ;;  %v630_v30 = vmin.f32 %v603_v43, %v619_v20 }
 0x3bf   : > { %v629_v32 = vmin.f32 %v601_v56, %v617_v22 }
 0x3c0   : > { %v2353_v1 = vsel %vm634_vm3, %v631_v21, %v2272_v31  ;;  %v2358_v4 = vsel %vm634_vm3, %v630_v30, %v2230_v25  ;;  %vm648_vm7 = vcmp.eq.f32.partialorder %v2284_v53, %v631_v21  ;;  %vm647_vm8 = vcmp.eq.f32.partialorder %v2242_v28, %v630_v30 }
 0x3c1   : > { %v2365_v3 = vsel %vm634_vm3, %v629_v32, %v2226_v23  ;;  %v656_v29 = vsel %vm648_vm7, 3e+30, %v2284_v53  ;;  %vm646_vm9 = vcmp.eq.f32.partialorder %v2239_v24, %v629_v32  ;;  %v655_v34 = vsel %vm647_vm8, 3e+30, %v2242_v28 }
 0x3c2   : > { %685 = vmin.xlane.f32.xlu2 %v656_v29  ;;  %v654_v38 = vsel %vm646_vm9, 3e+30, %v2239_v24  ;;  %683 = vmin.xlane.f32.xlu1 %v655_v34  ;;  %v667_v24 = vsel %vm659_vm10, 3e+30, %v2300_v35  ;;  %vm662_vm13 = vcmp.eq.f32.partialorder %v2315_v40, %v629_v32  ;;  %v668_v31 = vsel %vm660_vm15, 3e+30, %v2292_v36 }
 0x3c3   : > { %681 = vmin.xlane.f32.xlu0 %v654_v38  ;;  %vm664_vm1 = vcmp.eq.f32.partialorder %v2310_v45, %v631_v21  ;;  %vm663_vm2 = vcmp.eq.f32.partialorder %v2307_v41, %v630_v30 }
 0x3c4   : > { %v671_v53 = vsel %vm663_vm2, 3e+30, %v2307_v41 }
 0x3c5   : > { %v625_v25 = vpop.xlane.xlu2 %624 }
 0x3c6   : > { %v623_v27 = vpop.xlane.xlu1 %622  ;;  %v633_v37 = vmin.f32 %v609_v59, %v625_v25 }
 0x3c7   : > { %v632_v49 = vmin.f32 %v607_v60, %v623_v27 }
 0x3c8   : > { %v2375_v23 = vsel %vm634_vm3, %v633_v37, %v2266_v52  ;;  %vm650_vm11 = vcmp.eq.f32.partialorder %v2278_v39, %v633_v37  ;;  %v670_v52 = vsel %vm662_vm13, 3e+30, %v2315_v40 }
 0x3c9   : > { %v641_v28 = vsel %vm634_vm3, %v632_v49, %v2262_v51  ;;  %vm649_vm12 = vcmp.eq.f32.partialorder %v2275_v33, %v632_v49  ;;  %v658_v26 = vsel %vm650_vm11, 3e+30, %v2278_v39  ;;  %v669_v51 = vsel %vm661_vm14, 3e+30, %v2295_v42 }
 0x3ca   : > { %691 = vmin.xlane.f32.xlu2 %v667_v24  ;;  %v657_v50 = vsel %vm649_vm12, 3e+30, %v2275_v33  ;;  %689 = vmin.xlane.f32.xlu1 %v658_v26  ;;  %vm665_vm0 = vcmp.eq.f32.partialorder %v2325_v44, %v632_v49  ;;  %v672_v39 = vsel %vm664_vm1, 3e+30, %v2310_v45  ;;  %vm666_vm3 = vcmp.eq.f32.partialorder %v2321_v54, %v633_v37 }
 0x3cb   : > { %687 = vmin.xlane.f32.xlu0 %v657_v50  ;;  %v673_v33 = vsel %vm665_vm0, 3e+30, %v2325_v44  ;;  %v674_v36 = vsel %vm666_vm3, 3e+30, %v2321_v54 }
 0x3d2   : > { %697 = vmin.xlane.f32.xlu2 %v670_v52  ;;  %695 = vmin.xlane.f32.xlu1 %v669_v51 }
 0x3d3   : > { %693 = vmin.xlane.f32.xlu0 %v668_v31 }
 0x3da   : > { %703 = vmin.xlane.f32.xlu2 %v673_v33  ;;  %701 = vmin.xlane.f32.xlu1 %v672_v39 }
 0x3db   : > { %699 = vmin.xlane.f32.xlu0 %v671_v53 }
 0x3e3   : > { %705 = vmin.xlane.f32.xlu0 %v674_v36 }
 0x42d   : > { %v678_v42 = vpop.xlane.xlu1 %677  ;;  %v680_v35 = vpop.xlane.xlu2 %679 }
 0x42e   : > { %v676_v40 = vpop.xlane.xlu0 %675 }
 0x435   : > { %v684_v48 = vpop.xlane.xlu1 %683  ;;  %v686_v55 = vpop.xlane.xlu2 %685 }
 0x436   : > { %v682_v43 = vpop.xlane.xlu0 %681 }
 0x43d   : > { %v690_v56 = vpop.xlane.xlu1 %689  ;;  %v692_v44 = vpop.xlane.xlu2 %691 }
 0x43e   : > { %v688_v45 = vpop.xlane.xlu0 %687  ;;  %v707_v58 = vmin.f32 %v676_v40, %v692_v44 }
 0x440   : > { %v716_v41 = vsel %vm715_vm4, %v707_v58, %v2344_v8 }
 0x441   : > { %724 = vst [vmem:[#allocation2 + $0x30] sm:$0xff] %v716_v41 }
 0x445   : > { %v696_v59 = vpop.xlane.xlu1 %695  ;;  %v698_v54 = vpop.xlane.xlu2 %697 }
 0x446   : > { %v694_v60 = vpop.xlane.xlu0 %693  ;;  %v709_v61 = vmin.f32 %v680_v35, %v696_v59  ;;  %v710_v62 = vmin.f32 %v682_v43, %v698_v54 }
 0x447   : > { %v708_v47 = vmin.f32 %v678_v42, %v694_v60 }
 0x448   : > { %v718_v63 = vsel %vm715_vm4, %v709_v61, %v2332_v46  ;;  %v719_v0 = vsel %vm715_vm4, %v710_v62, %v2365_v3 }
 0x449   : > { %v717_v5 = vsel %vm715_vm4, %v708_v47, %v2337_v7  ;;  %726 = vst [vmem:[#allocation2 + $0x18] sm:$0xff] %v718_v63 }
 0x44a   : > { %725 = vst [vmem:[#allocation2] sm:$0xff] %v717_v5 }
 0x44b   : > { %727 = vst [vmem:[#allocation2 + $0x10] sm:$0xff] %v719_v0 }
 0x44d   : > { %v702_v6 = vpop.xlane.xlu1 %701  ;;  %v704_v8 = vpop.xlane.xlu2 %703 }
 0x44e   : > { %v700_v17 = vpop.xlane.xlu0 %699  ;;  %v712_v18 = vmin.f32 %v686_v55, %v702_v6  ;;  %v713_v19 = vmin.f32 %v688_v45, %v704_v8 }
 0x44f   : > { %v711_v2 = vmin.f32 %v684_v48, %v700_v17 }
 0x450   : > { %v721_v46 = vsel %vm715_vm4, %v712_v18, %v2353_v1  ;;  %v722_v20 = vsel %vm715_vm4, %v713_v19, %v641_v28 }
 0x451   : > { %v720_v7 = vsel %vm715_vm4, %v711_v2, %v2358_v4  ;;  %729 = vst [vmem:[#allocation2 + $0x20] sm:$0xff] %v721_v46 }
 0x452   : > { %728 = vst [vmem:[#allocation2 + $0x8] sm:$0xff] %v720_v7 }
 0x453   : > { %730 = vst [vmem:[#allocation2 + $0x28] sm:$0xff] %v722_v20 }
 0x456   : > { %v706_v21 = vpop.xlane.xlu0 %705 }
 0x457   : > { %v714_v22 = vmin.f32 %v690_v56, %v706_v21 }
 0x459   : > { %v723_v30 = vsel %vm715_vm4, %v714_v22, %v2375_v23 }
 0x45a   : > { %731 = vst [vmem:[#allocation2 + $0x38] sm:$0xff] %v723_v30 }
 0x45b PF: > { %p1414_p13 = scmp.ne.s32.totalorder %s1803_s19, 1 }
 0x45c   : > { %p1415_p1 = scmp.ne.s32.totalorder (!%p1414_p13), %s1799_s18, 0 }
 0x45d   : > { %735 = sbr.rel (%p1414_p13) target bundleno = 1800 (0x708), region = 52 }
 0x462   : > { %739 = sbr.rel (%p1415_p1) target bundleno = 1144 (0x478), region = 56 }
 0x467   : > { %v1829_v32 = vmov 0.0  }
 0x468   : > { %740 = vst [vmem:[%s2032_s29] sm:$0xff] %v1829_v32 }
 0x469   : > { %741 = vst [vmem:[%s2032_s29 + $0x8] sm:$0xff] %v1829_v32 }
 0x46a   : > { %742 = vst [vmem:[%s2032_s29 + $0x10] sm:$0xff] %v1829_v32 }
 0x46b   : > { %743 = vst [vmem:[%s2032_s29 + $0x18] sm:$0xff] %v1829_v32 }
 0x46c   : > { %744 = vst [vmem:[%s2032_s29 + $0x20] sm:$0xff] %v1829_v32 }
 0x46d   : > { %745 = vst [vmem:[%s2032_s29 + $0x28] sm:$0xff] %v1829_v32 }
 0x46e   : > { %746 = vst [vmem:[%s2032_s29 + $0x30] sm:$0xff] %v1829_v32 }
 0x46f   : > { %747 = vst [vmem:[%s2032_s29 + $0x38] sm:$0xff] %v1829_v32 }
 0x470   : > { %748 = vst [vmem:[#allocation3] sm:$0xff] %v1829_v32 }
 0x471   : > { %749 = vst [vmem:[#allocation3 + $0x18] sm:$0xff] %v1829_v32 }
 0x472   : > { %750 = vst [vmem:[#allocation3 + $0x10] sm:$0xff] %v1829_v32 }
 0x473   : > { %751 = vst [vmem:[#allocation3 + $0x20] sm:$0xff] %v1829_v32 }
 0x474   : > { %752 = vst [vmem:[#allocation3 + $0x28] sm:$0xff] %v1829_v32 }
 0x475   : > { %753 = vst [vmem:[#allocation3 + $0x8] sm:$0xff] %v1829_v32 }
 0x476   : > { %754 = vst [vmem:[#allocation3 + $0x30] sm:$0xff] %v1829_v32 }
 0x477   : > { %755 = vst [vmem:[#allocation3 + $0x38] sm:$0xff] %v1829_v32 }
 0x478 PF: > { %v758_v57 = vld [vmem:[#allocation2 + $0x18] sm:$0xff]  ;;  %v756_v1 = vld [vmem:[#allocation2 + $0x30] sm:$0xff]  ;;  %v1830_v4 = vmov 3   ;;  %v760_v3 = vld [vmem:[#allocation2 + $0x8] sm:$0xff] }
 0x479   : > { %1618 = vset.pattern.permute.xlu1 %v1830_v4  ;;  %1617 = vset.pattern.permute.xlu0 %v1830_v4  ;;  %v759_v29 = vld [vmem:[#allocation2 + $0x10] sm:$0xff]  ;;  %v757_v34 = vld [vmem:[#allocation2] sm:$0xff]  ;;  %v763_v25 = vld [vmem:[#allocation2 + $0x38] sm:$0xff] }
 0x47a   : > { %776 = vperm.xlu1 %1618, %v758_v57   ;;  %766 = vperm.xlu0 %1617, %v756_v1   ;;  %v761_v38 = vld [vmem:[#allocation2 + $0x20] sm:$0xff]  ;;  %v762_v27 = vld [vmem:[#allocation2 + $0x28] sm:$0xff] }
 0x47b   : > { %1619 = vset.pattern.permute.xlu2 %v1830_v4 }
 0x47c   : > { %786 = vperm.xlu2 %1619, %v760_v3  }
 0x482   : > { %781 = vperm.xlu1 %1618, %v759_v29   ;;  %771 = vperm.xlu0 %1617, %v757_v34  }
 0x484   : > { %791 = vperm.xlu2 %1619, %v761_v38  }
 0x48a   : > { %801 = vperm.xlu1 %1618, %v763_v25   ;;  %796 = vperm.xlu0 %1617, %v762_v27  }
 0x4d6   : > { %v2433_v37 = vpop.permute.xlu2 %786 }
 0x4d7   : > { %v808_v51 = vsub.f32 %v2019_v11, %v2433_v37 }
 0x4de   : > { %v2443_v26 = vpop.permute.xlu2 %791 }
 0x4df   : > { %v809_v50 = vsub.f32 %v2027_v15, %v2443_v26 }
 0x4ec   : > { %v2435_v49 = vpop.permute.xlu1 %776  ;;  %v2437_v23 = vpop.permute.xlu0 %766 }
 0x4ed   : > { %v804_v31 = vsub.f32 %v2015_v9, %v2437_v23  ;;  %v806_v33 = vsub.f32 %v2017_v10, %v2435_v49 }
 0x4ef   : > { %v812_v48 = vmin.f32 %v804_v31, %v808_v51 }
 0x4f4   : > { %v2439_v28 = vpop.permute.xlu1 %781  ;;  %v2441_v24 = vpop.permute.xlu0 %771 }
 0x4f5   : > { %v805_v52 = vsub.f32 %v2023_v13, %v2441_v24  ;;  %v807_v36 = vsub.f32 %v2025_v14, %v2439_v28 }
 0x4f7   : > { %v813_v42 = vmin.f32 %v805_v52, %v809_v50 }
 0x4f9   : > { %v816_v56 = vmin.f32 %v812_v48, %v813_v42 }
 0x4fc   : > { %v2455_v39 = vpop.permute.xlu1 %801  ;;  %v2457_v53 = vpop.permute.xlu0 %796 }
 0x4fd   : > { %v811_v35 = vsub.f32 %v2029_v16, %v2455_v39  ;;  %v810_v40 = vsub.f32 %v2021_v12, %v2457_v53 }
 0x4ff   : > { %v815_v55 = vmin.f32 %v807_v36, %v811_v35  ;;  %v814_v43 = vmin.f32 %v806_v33, %v810_v40 }
 0x501   : > { %v817_v44 = vmin.f32 %v814_v43, %v815_v55 }
 0x503   : > { %v818_v45 = vmin.f32 %v816_v56, %v817_v44 }
 0x505   : > { %819 = vmin.xlane.f32.xlu2 %v818_v45 }
 0x578   : > { %v820_v58 = vpop.xlane.xlu2 %819 }
 0x579   : > { %v821_v41 = vrot.slane %v820_v58, 4 }
 0x57b   : > { %v822_v59 = vmin.f32 %v820_v58, %v821_v41 }
 0x57d   : > { %v823_v54 = vrot.slane %v822_v59, 2 }
 0x57f   : > { %v824_v60 = vmin.f32 %v822_v59, %v823_v54 }
 0x581   : > { %v825_v61 = vrot.slane %v824_v60, 1 }
 0x583   : > { %v826_v62 = vmin.f32 %v824_v60, %v825_v61 }
 0x585   : > { %1485 = vpush %v826_v62 }
 0x5b6   : > { %s1486_s19 = spop %1485 }
 0x5b7   : > { %p828_p3 = scmp.le.f32.partialorder %s1486_s19, 0.0 }
 0x5b8   : > { %v1007_v47 = vld [vmem:[%s1987_s27 + $0x78] sm:$0xff] (%p828_p3)  ;;  %v1006_v63 = vld [vmem:[%s1987_s27 + $0x70] sm:$0xff] (%p828_p3)  ;;  %v844_v0 = vmax.f32 (%p828_p3), %v2019_v11, 0.0  ;;  %v846_v5 = vmax.f32 (%p828_p3), %v2021_v12, 0.0  ;;  %v840_v6 = vmax.f32 (%p828_p3), %v2015_v9, 0.0  ;;  %v842_v8 = vmax.f32 (%p828_p3), %v2017_v10, 0.0 }
 0x5b9   : > { %831 = sbr.rel (!%p828_p3) target bundleno = 1640 (0x668), region = 60  ;;  %1436 = vmatpush.msra.mxu2 (%p828_p3), %v1007_v47  ;;  %1437 = vmatpush.msra.mxu3 (%p828_p3), %v1007_v47  ;;  %v845_v17 = vmax.f32 (%p828_p3), %v2027_v15, 0.0  ;;  %v1005_v18 = vld [vmem:[%s1987_s27 + $0x68] sm:$0xff] (%p828_p3)  ;;  %v847_v2 = vmax.f32 (%p828_p3), %v2029_v16, 0.0  ;;  %v841_v20 = vmax.f32 (%p828_p3), %v2023_v13, 0.0  ;;  %v1004_v7 = vld [vmem:[%s1987_s27 + $0x60] sm:$0xff] (%p828_p3)  ;;  %vm836_vm11 = vcmp.le.f32.partialorder (%p828_p3), %v2019_v11, %v2433_v37 }
 0x5ba   : > { %1008 = vmatpush.msra.mxu0 (%p828_p3), %v1007_v47  ;;  %1435 = vmatpush.msra.mxu1 (%p828_p3), %v1007_v47  ;;  %v2473_v19 = vadd.f32 (%p828_p3), 1e-16, %v844_v0  ;;  %v2476_v46 = vadd.f32 (%p828_p3), 1e-16, %v846_v5  ;;  %v2481_v21 = vadd.f32 (%p828_p3), 1e-16, %v840_v6  ;;  %vm838_vm1 = vcmp.le.f32.partialorder (%p828_p3), %v2021_v12, %v2457_v53 }
 0x5bb   : > { %1439 = vmatpush.msra.mxu2 (%p828_p3), %v1006_v63  ;;  %1440 = vmatpush.msra.mxu3 (%p828_p3), %v1006_v63  ;;  %v2484_v22 = vadd.f32 (%p828_p3), 1e-16, %v842_v8  ;;  %v2486_v30 = vadd.f32 (%p828_p3), 1e-16, %v845_v17  ;;  %v843_v32 = vmax.f32 (%p828_p3), %v2025_v14, 0.0  ;;  %v1003_v57 = vld [vmem:[%s1987_s27 + $0x58] sm:$0xff] (%p828_p3)  ;;  %vm832_vm2 = vcmp.le.f32.partialorder (%p828_p3), %v2015_v9, %v2437_v23 }
 0x5bc   : > { %1009 = vmatpush.msra.mxu0 (%p828_p3), %v1006_v63  ;;  %1438 = vmatpush.msra.mxu1 (%p828_p3), %v1006_v63  ;;  %1620 = vrsqrt.f32 (%p828_p3), %v2473_v19  ;;  %v2491_v1 = vadd.f32 (%p828_p3), 1e-16, %v847_v2  ;;  %v2493_v4 = vadd.f32 (%p828_p3), 1e-16, %v841_v20  ;;  %v1002_v3 = vld [vmem:[%s1987_s27 + $0x50] sm:$0xff] (%p828_p3)  ;;  %v1001_v38 = vld [vmem:[%s1987_s27 + $0x48] sm:$0xff] (%p828_p3)  ;;  %vm902_vm5 = vweird.f32 (%p828_p3), %v2473_v19 }
 0x5bd   : > { %1442 = vmatpush.msra.mxu2 (%p828_p3), %v1005_v18  ;;  %1443 = vmatpush.msra.mxu3 (%p828_p3), %v1005_v18  ;;  %1622 = vrsqrt.f32 (%p828_p3), %v2476_v46  ;;  %v2499_v29 = vadd.f32 (%p828_p3), 1e-16, %v843_v32  ;;  %v1000_v52 = vld [vmem:[%s1987_s27 + $0x40] sm:$0xff] (%p828_p3)  ;;  %v999_v35 = vld [vmem:[%s1987_s27 + $0x38] sm:$0xff] (%p828_p3)  ;;  %v998_v45 = vld [vmem:[%s1987_s27 + $0x30] sm:$0xff] (%p828_p3)  ;;  %vm922_vm7 = vweird.f32 (%p828_p3), %v2476_v46  ;;  %vm862_vm9 = vweird.f32 (%p828_p3), %v2481_v21 }
 0x5be   : > { %1010 = vmatpush.msra.mxu0 %v1005_v18  ;;  %1441 = vmatpush.msra.mxu1 %v1005_v18  ;;  %1624 = vrsqrt.f32 %v2481_v21  ;;  %v997_v47 = vld [vmem:[%s1987_s27 + $0x28] sm:$0xff]  ;;  %v996_v5 = vld [vmem:[%s1987_s27 + $0x20] sm:$0xff]  ;;  %v995_v32 = vld [vmem:[%s1987_s27 + $0x18] sm:$0xff]  ;;  %vm882_vm13 = vweird.f32 %v2484_v22  ;;  %vm834_vm3 = vcmp.le.f32.partialorder %v2017_v10, %v2435_v49 }
 0x5bf   : > { %1445 = vmatpush.msra.mxu2 %v1004_v7  ;;  %1446 = vmatpush.msra.mxu3 %v1004_v7  ;;  %1626 = vrsqrt.f32 %v2484_v22  ;;  %v947_v12 = vld [vmem:[#allocation3 + $0x20] sm:$0xff]  ;;  %v945_v53 = vld [vmem:[#allocation3 + $0x18] sm:$0xff] }
 0x5c0   : > { %1011 = vmatpush.msra.mxu0 %v1004_v7  ;;  %1444 = vmatpush.msra.mxu1 %v1004_v7  ;;  %1628 = vrsqrt.f32 %v2486_v30 }
 0x5c1   : > { %1448 = vmatpush.msra.mxu2 %v1003_v57  ;;  %1449 = vmatpush.msra.mxu3 %v1003_v57  ;;  %1630 = vrsqrt.f32 %v2491_v1 }
 0x5c2   : > { %v2501_v34 = vpop.eup %1620  ;;  %1012 = vmatpush.msra.mxu0 %v1003_v57  ;;  %1447 = vmatpush.msra.mxu1 %v1003_v57  ;;  %1632 = vrsqrt.f32 %v2493_v4 }
 0x5c3   : > { %v2505_v25 = vpop.eup %1622  ;;  %1451 = vmatpush.msra.mxu2 %v1002_v3  ;;  %1452 = vmatpush.msra.mxu3 %v1002_v3  ;;  %v897_v27 = vmul.f32 %v2501_v34, %v2473_v19  ;;  %1634 = vrsqrt.f32 %v2499_v29  ;;  %vm903_vm6 = vweird.f32 %v2501_v34 }
 0x5c4   : > { %v2510_v50 = vpop.eup %1624  ;;  %1013 = vmatpush.msra.mxu0 %v1002_v3  ;;  %1450 = vmatpush.msra.mxu1 %v1002_v3  ;;  %v917_v51 = vmul.f32 %v2505_v25, %v2476_v46  ;;  %vm923_vm8 = vweird.f32 %v2505_v25  ;;  %vm2562_vm12 = vmor %vm902_vm5, %vm903_vm6  ;;  %vm912_vm5 = vweird.f32 %v2486_v30  ;;  %v988_v3 = vld [vmem:[%s2032_s29 + $0x20] sm:$0xff] }
 0x5c5   : > { %v2515_v31 = vpop.eup %1626  ;;  %1454 = vmatpush.msra.mxu2 %v1001_v38  ;;  %1455 = vmatpush.msra.mxu3 %v1001_v38  ;;  %v898_v33 = vmul.f32 %v2501_v34, %v897_v27  ;;  %v857_v36 = vmul.f32 %v2510_v50, %v2481_v21  ;;  %vm863_vm10 = vweird.f32 %v2510_v50  ;;  %vm2575_vm15 = vmor %vm922_vm7, %vm923_vm8  ;;  %vm932_vm7 = vweird.f32 %v2491_v1 }
 0x5c6   : > { %v2520_v42 = vpop.eup %1628  ;;  %1014 = vmatpush.msra.mxu0 %v1001_v38  ;;  %1453 = vmatpush.msra.mxu1 %v1001_v38  ;;  %v918_v40 = vmul.f32 %v2505_v25, %v917_v51  ;;  %v877_v48 = vmul.f32 %v2515_v31, %v2484_v22  ;;  %vm883_vm14 = vweird.f32 %v2515_v31  ;;  %v994_v38 = vld [vmem:[%s1987_s27 + $0x10] sm:$0xff]  ;;  %vm2584_vm0 = vmor %vm862_vm9, %vm863_vm10  ;;  %vm872_vm9 = vweird.f32 %v2493_v4 }
 0x5c7   : > { %v2526_v55 = vpop.eup %1630  ;;  %1457 = vmatpush.msra.mxu2 %v1000_v52  ;;  %1458 = vmatpush.msra.mxu3 %v1000_v52  ;;  %v899_v43 = vmul.f32 0.5, %v898_v33  ;;  %v858_v56 = vmul.f32 %v2510_v50, %v857_v36  ;;  %v907_v59 = vmul.f32 %v2520_v42, %v2486_v30  ;;  %vm2600_vm4 = vmor %vm882_vm13, %vm883_vm14  ;;  %vm913_vm6 = vweird.f32 %v2520_v42 }
 0x5c8   : > { %v2529_v44 = vpop.eup %1632  ;;  %1015 = vmatpush.msra.mxu0 %v1000_v52  ;;  %1456 = vmatpush.msra.mxu1 %v1000_v52  ;;  %v919_v58 = vmul.f32 0.5, %v918_v40  ;;  %v878_v41 = vmul.f32 %v2515_v31, %v877_v48  ;;  %v927_v54 = vmul.f32 %v2526_v55, %v2491_v1  ;;  %vm933_vm8 = vweird.f32 %v2526_v55 }
 0x5c9   : > { %v2537_v60 = vpop.eup %1634  ;;  %1460 = vmatpush.msra.mxu2 %v999_v35  ;;  %1461 = vmatpush.msra.mxu3 %v999_v35  ;;  %v859_v61 = vmul.f32 0.5, %v858_v56  ;;  %v867_v62 = vmul.f32 %v2529_v44, %v2493_v4  ;;  %v900_v0 = vsub.f32 1.5, %v899_v43  ;;  %v908_v8 = vmul.f32 %v2520_v42, %v907_v59  ;;  %v993_v43 = vld [vmem:[%s1987_s27 + $0x8] sm:$0xff]  ;;  %v992_v56 = vld [vmem:[%s1987_s27] sm:$0xff] }
 0x5ca   : > { %1016 = vmatpush.msra.mxu0 %v999_v35  ;;  %1459 = vmatpush.msra.mxu1 %v999_v35  ;;  %v879_v63 = vmul.f32 0.5, %v878_v41  ;;  %v920_v6 = vsub.f32 1.5, %v919_v58  ;;  %v928_v17 = vmul.f32 %v2526_v55, %v927_v54  ;;  %v887_v18 = vmul.f32 %v2537_v60, %v2499_v29  ;;  %v987_v35 = vld [vmem:[%s2032_s29 + $0x18] sm:$0xff] }
 0x5cb   : > { %1463 = vmatpush.msra.mxu2 %v998_v45  ;;  %1464 = vmatpush.msra.mxu3 %v998_v45  ;;  %v860_v2 = vsub.f32 1.5, %v859_v61  ;;  %v868_v7 = vmul.f32 %v2529_v44, %v867_v62  ;;  %v901_v27 = vmul.f32 %v2501_v34, %v900_v0  ;;  %v909_v51 = vmul.f32 0.5, %v908_v8  ;;  %v949_v8 = vld [vmem:[#allocation3 + $0x8] sm:$0xff] }
 0x5cc   : > { %1017 = vmatpush.msra.mxu0 %v998_v45  ;;  %1462 = vmatpush.msra.mxu1 %v998_v45  ;;  %v880_v20 = vsub.f32 1.5, %v879_v63  ;;  %v888_v57 = vmul.f32 %v2537_v60, %v887_v18  ;;  %v921_v52 = vmul.f32 %v2505_v25, %v920_v6  ;;  %v929_v33 = vmul.f32 0.5, %v928_v17 }
 0x5cd   : > { %1466 = vmatpush.msra.mxu2 %v997_v47  ;;  %1467 = vmatpush.msra.mxu3 %v997_v47  ;;  %v861_v36 = vmul.f32 %v2510_v50, %v860_v2  ;;  %v869_v40 = vmul.f32 0.5, %v868_v7  ;;  %v905_v45 = vsel %vm2562_vm12, %v2501_v34, %v901_v27  ;;  %v910_v58 = vsub.f32 1.5, %v909_v51  ;;  %vm2627_vm12 = vmor %vm912_vm5, %vm913_vm6 }
 0x5ce   : > { %1018 = vmatpush.msra.mxu0 %v997_v47  ;;  %1465 = vmatpush.msra.mxu1 %v997_v47  ;;  %v881_v46 = vmul.f32 %v2515_v31, %v880_v20  ;;  %v889_v48 = vmul.f32 0.5, %v888_v57  ;;  %v925_v22 = vsel %vm2575_vm15, %v2505_v25, %v921_v52  ;;  %v930_v41 = vsub.f32 1.5, %v929_v33  ;;  %vm2644_vm15 = vmor %vm932_vm7, %vm933_vm8 }
 0x5cf   : > { %1469 = vmatpush.msra.mxu2 %v996_v5  ;;  %1470 = vmatpush.msra.mxu3 %v996_v5  ;;  %v865_v59 = vsel %vm2584_vm0, %v2510_v50, %v861_v36  ;;  %v870_v61 = vsub.f32 1.5, %v869_v40  ;;  %vm873_vm10 = vweird.f32 %v2529_v44  ;;  %vm892_vm13 = vweird.f32 %v2499_v29  ;;  %v951_v36 = vld [vmem:[#allocation3 + $0x38] sm:$0xff]  ;;  %v950_v40 = vld [vmem:[#allocation3 + $0x30] sm:$0xff] }
 0x5d0   : > { %1019 = vmatpush.msra.mxu0 %v996_v5  ;;  %1468 = vmatpush.msra.mxu1 %v996_v5  ;;  %v885_v54 = vsel %vm2600_vm4, %v2515_v31, %v881_v46  ;;  %v890_v34 = vsub.f32 1.5, %v889_v48  ;;  %vm893_vm14 = vweird.f32 %v2537_v60  ;;  %v911_v50 = vmul.f32 %v2520_v42, %v910_v58  ;;  %vm874_vm0 = vmor %vm872_vm9, %vm873_vm10  ;;  %v985_v46 = vld [vmem:[%s2032_s29 + $0x8] sm:$0xff] }
 0x5d1   : > { %1472 = vmatpush.msra.mxu2 %v995_v32  ;;  %1473 = vmatpush.msra.mxu3 %v995_v32  ;;  %v938_v31 = vsel %vm834_vm3, %v885_v54, 0.0  ;;  %v936_v62 = vsel %vm832_vm2, %v865_v59, 0.0  ;;  %v931_v47 = vmul.f32 %v2526_v55, %v930_v41  ;;  %v871_v63 = vmul.f32 %v2529_v44, %v870_v61  ;;  %vm894_vm4 = vmor %vm892_vm13, %vm893_vm14 }
 0x5d2   : > { %1020 = vmatpush.msra.mxu0 %v995_v32  ;;  %1471 = vmatpush.msra.mxu1 %v995_v32  ;;  %v891_v1 = vmul.f32 %v2537_v60, %v890_v34  ;;  %v940_v0 = vsel %vm836_vm11, %v905_v45, 0.0  ;;  %vm837_vm5 = vcmp.le.f32.partialorder %v2027_v15, %v2443_v26  ;;  %vm835_vm6 = vcmp.le.f32.partialorder %v2025_v14, %v2439_v28  ;;  %v946_v28 = vld [vmem:[#allocation3 + $0x10] sm:$0xff]  ;;  %v948_v26 = vld [vmem:[#allocation3 + $0x28] sm:$0xff] }
 0x5d3   : > { %1475 = vmatpush.msra.mxu2 %v994_v38  ;;  %1476 = vmatpush.msra.mxu3 %v994_v38  ;;  %v915_v9 = vsel %vm2627_vm12, %v2520_v42, %v911_v50  ;;  %v935_v10 = vsel %vm2644_vm15, %v2526_v55, %v931_v47  ;;  %v875_v11 = vsel %vm874_vm0, %v2529_v44, %v871_v63  ;;  %v942_v23 = vsel %vm838_vm1, %v925_v22, 0.0 }
 0x5d4   : > { %1021 = vmatpush.msra.mxu0 %v994_v38  ;;  %1474 = vmatpush.msra.mxu1 %v994_v38  ;;  %v895_v15 = vsel %vm894_vm4, %v2537_v60, %v891_v1  ;;  %v941_v37 = vsel %vm837_vm5, %v915_v9, 0.0  ;;  %v990_v38 = vld [vmem:[%s2032_s29 + $0x30] sm:$0xff] }
 0x5d5   : > { %1478 = vmatpush.msra.mxu2 %v993_v43  ;;  %1479 = vmatpush.msra.mxu3 %v993_v43 }
 0x5d6   : > { %1022 = vmatpush.msra.mxu0 %v993_v43  ;;  %1477 = vmatpush.msra.mxu1 %v993_v43 }
 0x5d7   : > { %1481 = vmatpush.msra.mxu2 %v992_v56  ;;  %1482 = vmatpush.msra.mxu3 %v992_v56 }
 0x5d8   : > { %1420 = vmatmul.msk.f32.vlgmr.msra.gmra.mxu2 %vm836_vm11, %v905_v45  ;;  %1422 = vmatmul.msk.f32.vlgmr.msra.gmra.mxu3 %vm838_vm1, %v925_v22  ;;  %vm839_vm11 = vcmp.le.f32.partialorder %v2029_v16, %v2455_v39  ;;  %v986_v16 = vld [vmem:[%s2032_s29 + $0x10] sm:$0xff]  ;;  %v984_v39 = vld [vmem:[%s2032_s29] sm:$0xff] }
 0x5d9   : > { %1023 = vmatpush.msra.mxu0 %v992_v56  ;;  %1480 = vmatpush.msra.mxu1 %v992_v56  ;;  %v943_v49 = vsel %vm839_vm11, %v935_v10, 0.0 }
 0x5da   : > { %1416 = vmatmul.msk.f32.vlgmr.msra.gmra.mxu0 %vm832_vm2, %v865_v59  ;;  %1418 = vmatmul.msk.f32.vlgmr.msra.gmra.mxu1 %vm834_vm3, %v885_v54  ;;  %vm833_vm2 = vcmp.le.f32.partialorder %v2023_v13, %v2441_v24  ;;  %v939_v13 = vsel %vm835_vm6, %v895_v15, 0.0  ;;  %v944_v24 = vld [vmem:[#allocation3] sm:$0xff]  ;;  %v989_v59 = vld [vmem:[%s2032_s29 + $0x28] sm:$0xff]  ;;  %v991_v54 = vld [vmem:[%s2032_s29 + $0x38] sm:$0xff] }
 0x5db   : > { %956 = vadd.xlane.f32.xlu1 %v938_v31  ;;  %952 = vadd.xlane.f32.xlu0 %v936_v62  ;;  %v937_v14 = vsel %vm833_vm2, %v875_v11, 0.0 }
 0x5dc   : > { %960 = vadd.xlane.f32.xlu2 %v940_v0 }
 0x5e0   : > { %1421 = vmatmul.msk.f32.gmra.mxu2 %vm837_vm5, %v915_v9  ;;  %1423 = vmatmul.msk.f32.gmra.mxu3 %vm839_vm11, %v935_v10 }
 0x5e2   : > { %1417 = vmatmul.msk.f32.gmra.mxu0 %vm833_vm2, %v875_v11  ;;  %1419 = vmatmul.msk.f32.gmra.mxu1 %vm835_vm6, %v895_v15 }
 0x5e3   : > { %958 = vadd.xlane.f32.xlu1 %v939_v13  ;;  %954 = vadd.xlane.f32.xlu0 %v937_v14 }
 0x5e4   : > { %962 = vadd.xlane.f32.xlu2 %v941_v37 }
 0x5eb   : > { %966 = vadd.xlane.f32.xlu1 %v943_v49  ;;  %964 = vadd.xlane.f32.xlu0 %v942_v23 }
 0x64e   : > { %v957_v4 = vpop.xlane.xlu1 %956  ;;  %v953_v29 = vpop.xlane.xlu0 %952 }
 0x64f   : > { %v970_v42 = vadd.f32 %v957_v4, %v946_v28  ;;  %v968_v55 = vadd.f32 %v953_v29, %v944_v24  ;;  %v961_v44 = vpop.xlane.xlu2 %960 }
 0x650   : > { %v972_v60 = vadd.f32 %v961_v44, %v948_v26 }
 0x651   : > { %978 = vst [vmem:[#allocation3 + $0x10] sm:$0xff] %v970_v42 }
 0x652   : > { %976 = vst [vmem:[#allocation3] sm:$0xff] %v968_v55 }
 0x653   : > { %980 = vst [vmem:[#allocation3 + $0x28] sm:$0xff] %v972_v60 }
 0x656   : > { %v959_v5 = vpop.xlane.xlu1 %958  ;;  %v955_v6 = vpop.xlane.xlu0 %954 }
 0x657   : > { %v1031_v17 = vpop.f32.mrf.mxu1  ;;  %v971_v18 = vadd.f32 %v959_v5, %v947_v12  ;;  %v1025_v2 = vpop.f32.mrf.mxu0  ;;  %v969_v32 = vadd.f32 %v955_v6, %v945_v53 }
 0x658   : > { %v1051_v20 = vadd.f32 %v1031_v17, %v986_v16  ;;  %v1049_v7 = vadd.f32 %v1025_v2, %v984_v39  ;;  %v963_v57 = vpop.xlane.xlu2 %962 }
 0x659   : > { %979 = vst [vmem:[#allocation3 + $0x20] sm:$0xff] %v971_v18  ;;  %v973_v27 = vadd.f32 %v963_v57, %v949_v8 }
 0x65a   : > { %1059 = vst [vmem:[%s2032_s29 + $0x10] sm:$0xff] %v1051_v20 }
 0x65b   : > { %v1037_v52 = vpop.f32.mrf.mxu2  ;;  %v1043_v19 = vpop.f32.mrf.mxu3  ;;  %1057 = vst [vmem:[%s2032_s29] sm:$0xff] %v1049_v7 }
 0x65c   : > { %v1053_v51 = vadd.f32 %v1037_v52, %v988_v3  ;;  %v1055_v33 = vadd.f32 %v1043_v19, %v990_v38  ;;  %977 = vst [vmem:[#allocation3 + $0x18] sm:$0xff] %v969_v32 }
 0x65d   : > { %981 = vst [vmem:[#allocation3 + $0x8] sm:$0xff] %v973_v27 }
 0x65e   : > { %1061 = vst [vmem:[%s2032_s29 + $0x20] sm:$0xff] %v1053_v51  ;;  %v967_v48 = vpop.xlane.xlu1 %966  ;;  %v965_v43 = vpop.xlane.xlu0 %964 }
 0x65f   : > { %1063 = vst [vmem:[%s2032_s29 + $0x30] sm:$0xff] %v1055_v33  ;;  %v1034_v21 = vpop.f32.mrf.mxu1  ;;  %v975_v56 = vadd.f32 %v967_v48, %v951_v36  ;;  %v1028_v45 = vpop.f32.mrf.mxu0  ;;  %v974_v41 = vadd.f32 %v965_v43, %v950_v40 }
 0x660   : > { %v1052_v22 = vadd.f32 %v1034_v21, %v987_v35  ;;  %v1050_v58 = vadd.f32 %v1028_v45, %v985_v46 }
 0x661   : > { %983 = vst [vmem:[#allocation3 + $0x38] sm:$0xff] %v975_v56 }
 0x662   : > { %1060 = vst [vmem:[%s2032_s29 + $0x18] sm:$0xff] %v1052_v22 }
 0x663   : > { %v1040_v61 = vpop.f32.mrf.mxu2  ;;  %v1046_v34 = vpop.f32.mrf.mxu3  ;;  %1058 = vst [vmem:[%s2032_s29 + $0x8] sm:$0xff] %v1050_v58 }
 0x664   : > { %v1054_v25 = vadd.f32 %v1040_v61, %v989_v59  ;;  %v1056_v50 = vadd.f32 %v1046_v34, %v991_v54  ;;  %982 = vst [vmem:[#allocation3 + $0x30] sm:$0xff] %v974_v41 }
 0x666   : > { %1062 = vst [vmem:[%s2032_s29 + $0x28] sm:$0xff] %v1054_v25 }
 0x667   : > { %1064 = vst [vmem:[%s2032_s29 + $0x38] sm:$0xff] %v1056_v50 }
 0x668 PF: > { %p1424_p4 = scmp.ne.s32.totalorder %s1799_s18, 1 }
 0x66a   : > { %1068 = sbr.rel (%p1424_p4) target bundleno = 1800 (0x708), region = 64 }
 0x66f   : > { %v1079_v30 = vld [vmem:[#allocation3 + $0x10] sm:$0xff]  ;;  %v1077_v31 = vld [vmem:[#allocation3] sm:$0xff]  ;;  %v1831_v47 = vmov 0   ;;  %v2718_v63 = vld [vmem:[#allocation3 + $0x18] sm:$0xff] }
 0x670   : > { %v2716_v62 = vld [vmem:[#allocation3 + $0x20] sm:$0xff]  ;;  %1637 = vset.pattern.permute.xlu1 %v1831_v47  ;;  %1636 = vset.pattern.permute.xlu0 %v1831_v47  ;;  %1639 = vrcp.f32 %v1079_v30  ;;  %v1124_v1 = vand.u32 2147483647, %v1079_v30  ;;  %v2721_v0 = vld [vmem:[#allocation3 + $0x38] sm:$0xff]  ;;  %v1126_v9 = vand.u32 2147483648, %v1079_v30  ;;  %v1096_v11 = vand.u32 2147483648, %v1077_v31 }
 0x671   : > { %1641 = vrcp.f32 %v1077_v31  ;;  %1638 = vset.pattern.permute.xlu2 %v1831_v47  ;;  %v1094_v10 = vand.u32 2147483647, %v1077_v31  ;;  %v2724_v15 = vld [vmem:[#allocation3 + $0x30] sm:$0xff]  ;;  %vm1120_vm1 = vweird.f32 %v1079_v30  ;;  %vm1090_vm7 = vweird.f32 %v1077_v31  ;;  %v2733_v28 = vld [vmem:[#allocation3 + $0x28] sm:$0xff] }
 0x672   : > { %1643 = vrcp.f32 %v2716_v62  ;;  %vm2727_vm3 = vcmp.eq.f32.partialorder %v1124_v1, 8.507059e+37  ;;  %v1127_v23 = vor.u32 1.1754944e-38, %v1126_v9  ;;  %vm1135_vm8 = vweird.f32 %v2716_v62  ;;  %v1082_v54 = vld [vmem:[#allocation3 + $0x8] sm:$0xff] }
 0x673   : > { %1645 = vrcp.f32 %v2718_v63  ;;  %vm2737_vm9 = vcmp.eq.f32.partialorder %v1094_v10, 8.507059e+37  ;;  %v1097_v29 = vor.u32 1.1754944e-38, %v1096_v11  ;;  %v1139_v42 = vand.u32 2147483647, %v2716_v62  ;;  %v1074_v3 = vld [vmem:[%s2032_s29 + $0x28] sm:$0xff] }
 0x674   : > { %1647 = vrcp.f32 %v2721_v0  ;;  %v1141_v60 = vand.u32 2147483648, %v2716_v62  ;;  %vm1105_vm13 = vweird.f32 %v2718_v63  ;;  %v1109_v8 = vand.u32 2147483647, %v2718_v63 }
 0x675   : > { %1649 = vrcp.f32 %v2724_v15  ;;  %vm2759_vm15 = vcmp.eq.f32.partialorder %v1139_v42, 8.507059e+37  ;;  %v1111_v20 = vand.u32 2147483648, %v2718_v63  ;;  %vm1195_vm2 = vweird.f32 %v2721_v0 }
 0x676   : > { %v1640_v13 = vpop.eup %1639  ;;  %1651 = vrcp.f32 %v2733_v28  ;;  %v1142_v35 = vor.u32 1.1754944e-38, %v1141_v60  ;;  %v1154_v25 = vand.u32 2147483647, %v2733_v28  ;;  %v1199_v47 = vand.u32 2147483647, %v2721_v0 }
 0x677   : > { %v1642_v37 = vpop.eup %1641  ;;  %v1116_v49 = vmul.f32 %v1640_v13, %v1079_v30  ;;  %vm1121_vm10 = vweird.f32 %v1640_v13  ;;  %v1112_v61 = vor.u32 1.1754944e-38, %v1111_v20  ;;  %1653 = vrcp.f32 %v1082_v54 }
 0x678   : > { %v2735_v24 = vpop.eup %1643  ;;  %v1086_v26 = vmul.f32 %v1642_v37, %v1077_v31  ;;  %vm1091_vm12 = vweird.f32 %v1642_v37  ;;  %vm2755_vm14 = vmor %vm1120_vm1, %vm1121_vm10  ;;  %vm2805_vm1 = vcmp.eq.f32.partialorder %v1109_v8, 8.507059e+37  ;;  %v1156_v31 = vand.u32 2147483648, %v2733_v28 }
 0x679   : > { %v1117_v55 = vsub.f32 1.0, %v1116_v49  ;;  %v1131_v44 = vmul.f32 %v2735_v24, %v2716_v62  ;;  %v2745_v12 = vpop.eup %1645  ;;  %vm2770_vm0 = vmor %vm1090_vm7, %vm1091_vm12  ;;  %vm1136_vm4 = vweird.f32 %v2735_v24  ;;  %v1201_v1 = vand.u32 2147483648, %v2721_v0 }
 0x67a   : > { %v1087_v16 = vsub.f32 1.0, %v1086_v26  ;;  %v2749_v39 = vpop.eup %1647  ;;  %v1101_v6 = vmul.f32 %v2745_v12, %v2718_v63  ;;  %vm1106_vm5 = vweird.f32 %v2745_v12  ;;  %vm2789_vm11 = vmor %vm1135_vm8, %vm1136_vm4  ;;  %v1186_v11 = vand.u32 2147483648, %v2724_v15 }
 0x67b   : > { %v1118_v53 = vmul.f32 %v1640_v13, %v1117_v55  ;;  %v1132_v5 = vsub.f32 1.0, %v1131_v44  ;;  %v1191_v7 = vmul.f32 %v2749_v39, %v2721_v0  ;;  %v2766_v32 = vpop.eup %1649  ;;  %vm2801_vm6 = vmor %vm1105_vm13, %vm1106_vm5  ;;  %vm1196_vm8 = vweird.f32 %v2749_v39 }
 0x67c   : > { %v1088_v18 = vmul.f32 %v1642_v37, %v1087_v16  ;;  %v1102_v27 = vsub.f32 1.0, %v1101_v6  ;;  %v1176_v51 = vmul.f32 %v2766_v32, %v2724_v15  ;;  %v1652_v40 = vpop.eup %1651  ;;  %vm1181_vm10 = vweird.f32 %v2766_v32 }
 0x67d   : > { %v1119_v57 = vadd.f32 %v1640_v13, %v1118_v53  ;;  %v1133_v38 = vmul.f32 %v2735_v24, %v1132_v5  ;;  %v1192_v19 = vsub.f32 1.0, %v1191_v7  ;;  %v1146_v59 = vmul.f32 %v1652_v40, %v2733_v28  ;;  %v1654_v42 = vpop.eup %1653  ;;  %v1073_v7 = vld [vmem:[%s2032_s29 + $0x20] sm:$0xff] }
 0x67e   : > { %v1089_v52 = vadd.f32 %v1642_v37, %v1088_v18  ;;  %v1103_v46 = vmul.f32 %v2745_v12, %v1102_v27  ;;  %v1177_v56 = vsub.f32 1.0, %v1176_v51  ;;  %vm1151_vm7 = vweird.f32 %v1652_v40 }
 0x67f   : > { %v1123_v33 = vsel %vm2755_vm14, %v1640_v13, %v1119_v57  ;;  %v1134_v36 = vadd.f32 %v2735_v24, %v1133_v38  ;;  %v1193_v34 = vmul.f32 %v2749_v39, %v1192_v19  ;;  %v1147_v30 = vsub.f32 1.0, %v1146_v59  ;;  %vm2840_vm14 = vmor %vm1195_vm2, %vm1196_vm8  ;;  %v1069_v19 = vld [vmem:[%s2032_s29] sm:$0xff] }
 0x680   : > { %v1128_v48 = vsel %vm2727_vm3, %v1127_v23, %v1123_v33  ;;  %v1093_v43 = vsel %vm2770_vm0, %v1642_v37, %v1089_v52  ;;  %v1104_v22 = vadd.f32 %v2745_v12, %v1103_v46  ;;  %vm1150_vm3 = vweird.f32 %v2733_v28  ;;  %v1071_v52 = vld [vmem:[%s2032_s29 + $0x10] sm:$0xff]  ;;  %v1072_v46 = vld [vmem:[%s2032_s29 + $0x18] sm:$0xff] }
 0x681   : > { %1217 = vperm.xlu1 %1637, %v1128_v48   ;;  %v1098_v45 = vsel %vm2737_vm9, %v1097_v29, %v1093_v43  ;;  %v1138_v50 = vsel %vm2789_vm11, %v2735_v24, %v1134_v36  ;;  %v1178_v63 = vmul.f32 %v2766_v32, %v1177_v56  ;;  %vm1180_vm9 = vweird.f32 %v2724_v15  ;;  %vm2831_vm12 = vmor %vm1150_vm3, %vm1151_vm7 }
 0x682   : > { %1207 = vperm.xlu0 %1636, %v1098_v45   ;;  %v1108_v62 = vsel %vm2801_vm6, %v2745_v12, %v1104_v22  ;;  %v1148_v9 = vmul.f32 %v1652_v40, %v1147_v30  ;;  %v1143_v10 = vsel %vm2759_vm15, %v1142_v35, %v1138_v50  ;;  %v1157_v14 = vor.u32 1.1754944e-38, %v1156_v31  ;;  %vm2848_vm15 = vmor %vm1180_vm9, %vm1181_vm10  ;;  %v1076_v45 = vld [vmem:[%s2032_s29 + $0x38] sm:$0xff]  ;;  %v1075_v22 = vld [vmem:[%s2032_s29 + $0x30] sm:$0xff] }
 0x683   : > { %v1113_v37 = vsel %vm2805_vm1, %v1112_v61, %v1108_v62  ;;  %v1194_v49 = vadd.f32 %v2749_v39, %v1193_v34  ;;  %vm1155_vm13 = vcmp.eq.f32.partialorder %v1154_v25, 8.507059e+37  ;;  %v1179_v28 = vadd.f32 %v2766_v32, %v1178_v63 }
 0x684   : > { %v1149_v23 = vadd.f32 %v1652_v40, %v1148_v9  ;;  %v1184_v26 = vand.u32 2147483647, %v2724_v15  ;;  %v1202_v0 = vor.u32 1.1754944e-38, %v1201_v1  ;;  %vm1200_vm0 = vcmp.eq.f32.partialorder %v1199_v47, 8.507059e+37 }
 0x685   : > { %v1198_v44 = vsel %vm2840_vm14, %v2749_v39, %v1194_v49  ;;  %v1187_v60 = vor.u32 1.1754944e-38, %v1186_v11  ;;  %v1161_v12 = vmul.f32 %v1654_v42, %v1082_v54  ;;  %v1183_v15 = vsel %vm2848_vm15, %v2766_v32, %v1179_v28 }
 0x686   : > { %v1153_v29 = vsel %vm2831_vm12, %v1652_v40, %v1149_v23  ;;  %vm1185_vm4 = vcmp.eq.f32.partialorder %v1184_v26, 8.507059e+37  ;;  %v1171_v16 = vand.u32 2147483648, %v1082_v54  ;;  %vm1165_vm5 = vweird.f32 %v1082_v54  ;;  %v1070_v40 = vld [vmem:[%s2032_s29 + $0x8] sm:$0xff] }
 0x687   : > { %v1158_v55 = vsel %vm1155_vm13, %v1157_v14, %v1153_v29  ;;  %v1162_v53 = vsub.f32 1.0, %v1161_v12  ;;  %vm1166_vm11 = vweird.f32 %v1654_v42  ;;  %v1169_v5 = vand.u32 2147483647, %v1082_v54 }
 0x688   : > { %1227 = vperm.xlu2 %1638, %v1158_v55   ;;  %v1203_v6 = vsel %vm1200_vm0, %v1202_v0, %v1198_v44  ;;  %v1188_v8 = vsel %vm1185_vm4, %v1187_v60, %v1183_v15  ;;  %vm1167_vm2 = vmor %vm1165_vm5, %vm1166_vm11  ;;  %v1172_v17 = vor.u32 1.1754944e-38, %v1171_v16 }
 0x689   : > { %1222 = vperm.xlu1 %1637, %v1143_v10   ;;  %v1163_v39 = vmul.f32 %v1654_v42, %v1162_v53  ;;  %vm1170_vm6 = vcmp.eq.f32.partialorder %v1169_v5, 8.507059e+37 }
 0x68a   : > { %1212 = vperm.xlu0 %1636, %v1113_v37  }
 0x68b   : > { %v1164_v18 = vadd.f32 %v1654_v42, %v1163_v39 }
 0x68d   : > { %v1168_v2 = vsel %vm1167_vm2, %v1654_v42, %v1164_v18 }
 0x68e   : > { %v1173_v20 = vsel %vm1170_vm6, %v1172_v17, %v1168_v2 }
 0x690   : > { %1232 = vperm.xlu2 %1638, %v1173_v20  }
 0x691   : > { %1242 = vperm.xlu1 %1637, %v1203_v6  }
 0x692   : > { %1237 = vperm.xlu0 %1636, %v1188_v8  }
 0x6e2   : > { %v1228_v32 = vpop.permute.xlu2 %1227 }
 0x6e3   : > { %v1249_v57 = vmul.f32 %v1228_v32, %v1073_v7 }
 0x6e5   : > { %1257 = vst [vmem:[%s2032_s29 + $0x20] sm:$0xff] %v1249_v57 }
 0x6ea   : > { %v1233_v38 = vpop.permute.xlu2 %1232 }
 0x6eb   : > { %v1250_v27 = vmul.f32 %v1233_v38, %v1074_v3 }
 0x6ed   : > { %1258 = vst [vmem:[%s2032_s29 + $0x28] sm:$0xff] %v1250_v27 }
 0x6f3   : > { %v1218_v51 = vpop.permute.xlu1 %1217 }
 0x6f4   : > { %v1247_v33 = vmul.f32 %v1218_v51, %v1071_v52  ;;  %v1208_v36 = vpop.permute.xlu0 %1207 }
 0x6f5   : > { %v1245_v35 = vmul.f32 %v1208_v36, %v1069_v19 }
 0x6f6   : > { %1255 = vst [vmem:[%s2032_s29 + $0x10] sm:$0xff] %v1247_v33 }
 0x6f7   : > { %1253 = vst [vmem:[%s2032_s29] sm:$0xff] %v1245_v35 }
 0x6fb   : > { %v1223_v48 = vpop.permute.xlu1 %1222 }
 0x6fc   : > { %v1248_v43 = vmul.f32 %v1223_v48, %v1072_v46  ;;  %v1213_v21 = vpop.permute.xlu0 %1212 }
 0x6fd   : > { %v1246_v56 = vmul.f32 %v1213_v21, %v1070_v40 }
 0x6fe   : > { %1256 = vst [vmem:[%s2032_s29 + $0x18] sm:$0xff] %v1248_v43 }
 0x6ff   : > { %1254 = vst [vmem:[%s2032_s29 + $0x8] sm:$0xff] %v1246_v56 }
 0x703   : > { %v1243_v58 = vpop.permute.xlu1 %1242 }
 0x704   : > { %v1252_v41 = vmul.f32 %v1243_v58, %v1076_v45  ;;  %v1238_v59 = vpop.permute.xlu0 %1237 }
 0x705   : > { %v1251_v54 = vmul.f32 %v1238_v59, %v1075_v22 }
 0x706   : > { %1260 = vst [vmem:[%s2032_s29 + $0x38] sm:$0xff] %v1252_v41 }
 0x707   : > { %1259 = vst [vmem:[%s2032_s29 + $0x30] sm:$0xff] %v1251_v54 }
 0x708 PF: > { %s1431_s18 = sshll.u32 %s1807_s20, 6  ;;  %s1274_s5 = sshll.u32 %s2032_s29, 4  ;;  %s1275_s5 = int_to_ptr.vmem [resolvable:$true] %s1274_s5 }
 0x709   : > { %s1273_s23 = scalar_lea.hbm %s2945_s3, %s1431_s18  ;;  %s1262_s25 = scalar_lea.sflag [#allocation6], %s239_s22 }
 0x70a   : > { %s1276_s11 = sshll.u32 %s1273_s23, 4  ;;  %s1705_s20 = scalar_lea.hbm %s2945_s3, 128  ;;  %s1277_s11 = int_to_ptr.hbm [resolvable:$true] %s1276_s11 }
 0x70b   : > { %s1699_s9 = sshra.s32 %s1277_s11, 4  ;;  %s1700_s9 = int_to_ptr.hbm [resolvable:$true] %s1699_s9 }
 0x70c   : > { %s1701_s7 = scalar_lea.hbm %s1700_s9, 64  ;;  %p1706_p5 = scmp.lt.s32.totalorder %s1700_s9, %s2945_s3 }
 0x70d   : > { %p1702_p6 = scmp.ne.s32.totalorder %s1700_s9, %s1701_s7  ;;  %p1707_p10 = scmp.lt.s32.totalorder %s1705_s20, %s1701_s7 }
 0x70f   : > { %p1703_p8 = pnand %p1702_p6, %p1963_p0  ;;  %p1708_p7 = por %p1707_p10, %p1706_p5 }
 0x711   : > { %p1704_p9 = pneg %p1703_p8 }
 0x713   : > { %p1709_p11 = pnand %p1708_p7, %p1704_p9 }
 0x715   : > { %1712 = shalt.err (!%p1709_p11)
}
 0x716   : > { %s1832_s22 = smov 128   ;;  %s1833_s29 = smov 8  }
 0x717   : > { %1489 = dma.vmem_to_hbm [thread:$0]  (%p1963_p0), %s1275_s5, 1024, %s1277_s11, %s1262_s25, %s1832_s22, %s1832_s22, %s1833_s29  }
 0x718 PF: > { %p1500_p12 = scmp.ge.s32.totalorder %s1823_s24, 2  ;;  %s1291_s4 = sand.u32 1, %s1775_s12  }
 0x719   : > { %s1292_s19 = scalar_lea.sflag [#allocation6], %s1291_s4 }
 0x71a   : > { %p1496_p13 = pnand %p1500_p12, %p1972_p2 }
 0x71c   : > { %p1497_p1 = pneg %p1496_p13 }
 0x71e   : > { %1770 = dma.done.wait (%p1497_p1), %s1292_s19, 1024  }
 0x71f   : > { %1772 = vsyncadd (%p1497_p1), %s1292_s19, 4294966272  ;;  %s19_s24 = sadd.s32 1, %s1823_s24   ;;  %s2998_s27 = sld [smem:[#allocation16_spill]] }
 0x720   : > { %p2898_p3 = scmp.ge.s32.totalorder %s19_s24, 10   ;;  %s2999_s21 = sld [smem:[#allocation10_spill]] }
 0x721   : > { %s3000_s19 = sld [smem:[#allocation11_spill]]  ;;  %s3006_s12 = smov %s1779_s13 }
 0x722   : > { %s3001_s20 = sld [smem:[#allocation12_spill]]  ;;  %s3007_s13 = smov %s1783_s14 }
 0x723   : > { %s3002_s28 = sld [smem:[#allocation13_spill]]  ;;  %s3008_s14 = smov %s1970_s6 }
 0x724   : > { %s3003_s22 = sld [smem:[#allocation14_spill]]  ;;  %s3009_s15 = smov %s1791_s16 }
 0x725   : > { %s3004_s23 = sld [smem:[#allocation15_spill]]  ;;  %s3010_s16 = smov %s1795_s17 }
 0x726   : > { %s3011_s17 = smov %s2998_s27  ;;  %s3012_s18 = smov %s2999_s21 }
 0x727   :  { %18 = sbr.rel (!%p2898_p3) target bundleno = 10 (0xa), region = 111 }
 0x729   : > { %s3013_s21 = smov %s3002_s28 }
 0x72c   :  { %1298 = vsyncpa [#allocation5], 1 }
 0x72d   :  { %1300 = vsyncpa [#allocation5 + $0x1], 1 }
 0x72e   :  { %1301 = vsyncpa [#allocation6], 1 }
 0x72f   :  { %1303 = vsyncpa [#allocation6 + $0x1], 1 }

</bundles_post_ra>
